<compile_context>
chip_gen: v7x
topology: tpu7x:2x2x1
jax: 0.10.0
libtpu: 0.0.40
codegen_flags: <defaults>
</compile_context>

<pallas_src>
from functools import partial

import jax
import jax.numpy as jnp
from jax import lax
from jax.experimental import pallas as pl
from jax.experimental.pallas import tpu as pltpu

LANE = 128
SUBLANE = 8


def _round_up(n, m):
    return ((n + m - 1) // m) * m


# ---------------------------------------------------------------------------
# Kernel: one grid step == one block of Tt timesteps.  Weights VMEM-resident.
# ---------------------------------------------------------------------------
def gru_seq_kernel(gx_ref, h0_ref, whru_ref, whc_ref, hseq_ref, h_scr):
    Hp = whc_ref.shape[0]            # padded hidden size (static)
    Tt = gx_ref.shape[0]             # timesteps per grid step (static)
    w_dtype = whru_ref.dtype         # bf16 weights

    @pl.when(pl.program_id(0) == 0)
    def _():
        h_scr[...] = h0_ref[...]     # load initial state once

    whru = whru_ref[...]             # hoisted out of the unrolled loop
    whc = whc_ref[...]

    def step(t, h):
        gx = gx_ref[t].astype(jnp.float32)                       # (Bp, 3Hp)
        # h-side matmul for the r and u gates: the irreducible sequential work.
        gh = jnp.dot(h.astype(w_dtype), whru,
                     preferred_element_type=jnp.float32)          # (Bp, 2Hp)
        r = jax.nn.sigmoid(gx[:, 0 * Hp:1 * Hp] + gh[:, 0 * Hp:1 * Hp])
        u = jax.nn.sigmoid(gx[:, 1 * Hp:2 * Hp] + gh[:, 1 * Hp:2 * Hp])
        # Only the (r*h)-dependent half of the candidate gate waits on r.
        c = jnp.tanh(gx[:, 2 * Hp:3 * Hp]
                     + jnp.dot((r * h).astype(w_dtype), whc,
                               preferred_element_type=jnp.float32))
        h_new = u * h + (1.0 - u) * c                             # f32
        hseq_ref[t] = h_new.astype(hseq_ref.dtype)                # lane-dense
        return h_new

    h_scr[...] = lax.fori_loop(0, Tt, step, h_scr[...], unroll=True)


# ---------------------------------------------------------------------------
# Parameter packing: fuse + pad (gate dim only) + cast weights.
# ---------------------------------------------------------------------------
def pack_params(params, input_size, hidden_size, weight_dtype=jnp.bfloat16):
    (wr_x, wr_h, br, wu_x, wu_h, bu, wc_x, wc_h, bc) = params
    F, H = input_size, hidden_size
    Hp = _round_up(H, LANE)

    # x-side weights are consumed by a plain XLA matmul outside the recurrence,
    # so F needs no padding; gate columns are padded to Hp so the precomputed
    # gx layout matches the kernel's lane-aligned gate slices.  Zero fill keeps
    # padded hidden columns exactly zero through the recurrence.
    wx = jnp.zeros((F, 3 * Hp), jnp.float32)
    wx = wx.at[:, 0 * Hp:0 * Hp + H].set(wr_x)
    wx = wx.at[:, 1 * Hp:1 * Hp + H].set(wu_x)
    wx = wx.at[:, 2 * Hp:2 * Hp + H].set(wc_x)

    whru = jnp.zeros((Hp, 2 * Hp), jnp.float32)
    whru = whru.at[:H, 0 * Hp:0 * Hp + H].set(wr_h)
    whru = whru.at[:H, 1 * Hp:1 * Hp + H].set(wu_h)

    whc = jnp.zeros((Hp, Hp), jnp.float32).at[:H, :H].set(wc_h)

    b = jnp.zeros((1, 3 * Hp), jnp.float32)
    b = b.at[:, 0 * Hp:0 * Hp + H].set(br)
    b = b.at[:, 1 * Hp:1 * Hp + H].set(bu)
    b = b.at[:, 2 * Hp:2 * Hp + H].set(bc)

    return (wx.astype(weight_dtype), whru.astype(weight_dtype),
            whc.astype(weight_dtype), b)        # bias stays f32 (folded into gx)


# ---------------------------------------------------------------------------
# Hoisted x-side gate pre-activations (one MXU-filling matmul for all T steps).
# ---------------------------------------------------------------------------
def precompute_input_gates(x_seq, wx, b, stream_dtype=jnp.bfloat16):
    T, B, F = x_seq.shape
    gx = jnp.dot(x_seq.reshape(T * B, F).astype(wx.dtype), wx,
                 preferred_element_type=jnp.float32) + b
    return gx.reshape(T, B, wx.shape[1]).astype(stream_dtype)


def _vmem_limit_bytes(buffer_bytes):
    try:
        physical = pltpu.get_tpu_info().vmem_capacity_bytes
    except Exception:                      # query unavailable: assume v7x (smallest)
        physical = 64 * 1024 * 1024
    cap = int(physical * 0.9)
    want = int(buffer_bytes * 1.25) + (8 << 20)   # headroom for Mosaic internals
    return min(max(want, 32 << 20), cap)


# ---------------------------------------------------------------------------
# Sequence forward: weight-resident, time-blocked GRU over T timesteps.
# ---------------------------------------------------------------------------
@partial(jax.jit, static_argnames=("hidden_size", "time_block"))
def gru_sequence_forward(x_seq, h0, packed, *, hidden_size, time_block=8):
    """x_seq: (T, B, F) f32, h0: (B, H) f32 -> h_seq: (T, B, H) f32."""
    T, B, F = x_seq.shape
    H = hidden_size
    wx, whru, whc, b = packed
    Hp = whc.shape[0]
    Bp = _round_up(B, SUBLANE)
    Tt = max(1, min(time_block, T))
    Tp = _round_up(T, Tt)

    # Hoisted, r-independent x-side matmul (plus bias) for all timesteps.
    gx = precompute_input_gates(x_seq, wx, b)                 # (T, B, 3Hp) bf16

    # Pad only when needed, on the bf16 data (half the bytes of padding raw x).
    # Padded batch rows get gx == 0 (no bias) so they stay exactly zero.
    if (Tp, Bp) != (T, B):
        gx_p = jnp.zeros((Tp, Bp, 3 * Hp), gx.dtype).at[:T, :B].set(gx)
    else:
        gx_p = gx
    h0_p = jnp.zeros((Bp, Hp), jnp.float32).at[:B, :H].set(h0.astype(jnp.float32))

    # VMEM budget from actual buffer sizes (double-buffered blocks + scratch),
    # capped by the physical VMEM of this generation.
    blk_gx = Tt * Bp * 3 * Hp * gx_p.dtype.itemsize
    blk_out = Tt * Bp * Hp * 4
    resident = (Bp * Hp * 4
                + whru.size * whru.dtype.itemsize
                + whc.size * whc.dtype.itemsize)
    scratch = Bp * Hp * 4
    vmem_limit = _vmem_limit_bytes(2 * (blk_gx + blk_out + resident) + scratch)

    # Recurrent-kernel cost only (the x-side matmul runs outside, MXU-filled).
    flops = Tp * 2 * Bp * (Hp * 2 * Hp + Hp * Hp)
    transcendentals = Tp * Bp * 3 * Hp
    bytes_accessed = (gx_p.size * gx_p.dtype.itemsize + Tp * Bp * Hp * 4
                      + h0_p.size * 4
                      + whru.size * whru.dtype.itemsize
                      + whc.size * whc.dtype.itemsize)

    h_seq_p = pl.pallas_call(
        gru_seq_kernel,
        out_shape=jax.ShapeDtypeStruct((Tp, Bp, Hp), jnp.float32),
        grid_spec=pltpu.PrefetchScalarGridSpec(
            num_scalar_prefetch=0,
            grid=(Tp // Tt,),
            in_specs=[
                pl.BlockSpec((Tt, Bp, 3 * Hp), lambda i: (i, 0, 0)),  # gx (bf16 stream)
                pl.BlockSpec((Bp, Hp), lambda i: (0, 0)),             # h0    (resident)
                pl.BlockSpec((Hp, 2 * Hp), lambda i: (0, 0)),         # Wh_ru (resident)
                pl.BlockSpec((Hp, Hp), lambda i: (0, 0)),             # Wh_c  (resident)
            ],
            out_specs=pl.BlockSpec((Tt, Bp, Hp), lambda i: (i, 0, 0)),
            scratch_shapes=[pltpu.VMEM((Bp, Hp), jnp.float32)],       # carried h
        ),
        compiler_params=pltpu.CompilerParams(
            dimension_semantics=("arbitrary",),   # recurrence is sequential
            vmem_limit_bytes=vmem_limit,
        ),
        cost_estimate=pl.CostEstimate(
            flops=flops,
            transcendentals=transcendentals,
            bytes_accessed=bytes_accessed),
    )(gx_p, h0_p, whru, whc)

    return h_seq_p[:T, :B, :H]


def gru_cell_forward(x, h, packed, hidden_size):
    """Single GRUCellBase.forward step: x (B, F), h (B, H) -> h_new (B, H)."""
    return gru_sequence_forward(x[None], h, packed,
                                hidden_size=hidden_size, time_block=1)[0]


# ---------------------------------------------------------------------------
# Pure-JAX references.
# ---------------------------------------------------------------------------
def gru_seq_reference(x_seq, h0, params):
    """Full-f32 reference matching the PyTorch module exactly."""
    (wr_x, wr_h, br, wu_x, wu_h, bu, wc_x, wc_h, bc) = params

    def step(h, x):
        r = jax.nn.sigmoid(x @ wr_x + h @ wr_h + br)
        u = jax.nn.sigmoid(x @ wu_x + h @ wu_h + bu)
        c = jnp.tanh(x @ wc_x + (r * h) @ wc_h + bc)
        h_new = u * h + (1.0 - u) * c
        return h_new, h_new

    _, h_seq = lax.scan(step, h0.astype(jnp.float32), x_seq.astype(jnp.float32))
    return h_seq


def gru_seq_matched_reference(x_seq, h0, packed, hidden_size):
    """Numerics-matched reference: bf16 weights, bf16-streamed gx, f32 state."""
    wx, whru, whc, b = packed
    H = hidden_size
    Hp = whc.shape[0]
    gx_seq = precompute_input_gates(x_seq, wx, b)                 # (T, B, 3Hp) bf16
    h0_p = jnp.zeros((h0.shape[0], Hp), jnp.float32).at[:, :H].set(h0)

    def step(h, gx):
        gx = gx.astype(jnp.float32)
        gh = jnp.dot(h.astype(whru.dtype), whru, preferred_element_type=jnp.float32)
        r = jax.nn.sigmoid(gx[:, 0 * Hp:1 * Hp] + gh[:, 0 * Hp:1 * Hp])
        u = jax.nn.sigmoid(gx[:, 1 * Hp:2 * Hp] + gh[:, 1 * Hp:2 * Hp])
        c = jnp.tanh(gx[:, 2 * Hp:3 * Hp]
                     + jnp.dot((r * h).astype(whc.dtype), whc,
                               preferred_element_type=jnp.float32))
        h_new = u * h + (1.0 - u) * c
        return h_new, h_new

    _, h_seq = lax.scan(step, h0_p, gx_seq)
    return h_seq[:, :, :H]


def init_params(key, input_size, hidden_size, dtype=jnp.float32):
    """Deterministic synthetic init (uniform, PyTorch-Linear-like scale)."""
    fan_in = input_size + hidden_size
    bound = 1.0 / jnp.sqrt(jnp.asarray(fan_in, dtype))
    keys = jax.random.split(key, 9)
    shapes = [
        (input_size, hidden_size), (hidden_size, hidden_size), (1, hidden_size),  # forget (r)
        (input_size, hidden_size), (hidden_size, hidden_size), (1, hidden_size),  # update (u)
        (input_size, hidden_size), (hidden_size, hidden_size), (1, hidden_size),  # candidate (c)
    ]
    return tuple(
        jax.random.uniform(k, s, dtype, minval=-bound, maxval=bound)
        for k, s in zip(keys, shapes)
    )


if __name__ == "__main__":
    B, F, H, T = 8, 16, 32, 12  # batch, input_size, hidden_size, seq_len
    key = jax.random.PRNGKey(0)
    kx, kp = jax.random.split(key, 2)

    x_seq = jax.random.normal(kx, (T, B, F), jnp.float32)
    h0 = jnp.zeros((B, H), jnp.float32)          # GRUCellBase.initialize_state

    params = init_params(kp, F, H)
    packed = pack_params(params, F, H, weight_dtype=jnp.bfloat16)

    # Weight-resident, time-blocked sequence run (grid = (ceil(T/Tt),)).
    h_seq = gru_sequence_forward(x_seq, h0, packed, hidden_size=H, time_block=8)
    jax.block_until_ready(h_seq)

    # Single step with the original module's forward signature.
    h1 = gru_cell_forward(x_seq[0], h0, packed, H)
    jax.block_until_ready(h1)

    assert h_seq.shape == (T, B, H) and h_seq.dtype == jnp.float32
    assert h1.shape == (B, H)
    # Single step must agree with step 0 of the sequence run.
    assert jnp.allclose(h1, h_seq[0], atol=1e-5, rtol=1e-5)

    # Numerics-matched reference (bf16 weights + bf16-streamed gx, f32 state).
    h_ref_matched = gru_seq_matched_reference(x_seq, h0, packed, H)
    assert jnp.allclose(h_seq, h_ref_matched, atol=2e-3, rtol=2e-3)

    # Original-module (full f32) reference: bf16 quantization error only.
    h_ref_f32 = gru_seq_reference(x_seq, h0, params)
    assert jnp.allclose(h_seq, h_ref_f32, atol=5e-2, rtol=5e-2)

    print("KERNEL_OK")
</pallas_src>

<mosaic_0001>
module attributes {stable_mosaic.version = 11 : i64} {
  func.func @gru_seq_kernel(%arg0: i32, %arg1: memref<8x8x384xbf16, #tpu.memory_space<vmem>>, %arg2: memref<8x128xf32, #tpu.memory_space<vmem>>, %arg3: memref<128x256xbf16, #tpu.memory_space<vmem>>, %arg4: memref<128x128xbf16, #tpu.memory_space<vmem>>, %arg5: memref<8x8x128xf32, #tpu.memory_space<vmem>>, %arg6: memref<8x128xf32, #tpu.memory_space<vmem>>) attributes {dimension_semantics = [#tpu.dimension_semantics<arbitrary>], iteration_bounds = array<i64: 2>, scalar_prefetch = 0 : i64, scratch_operands = 1 : i64, tpu.core_type = #tpu.core_type<tc>, window_params = [{transform_indices = @transform_0, window_bounds = array<i64: 8, 8, 384>}, {pipeline_mode = #tpu.pipeline_mode<synchronous>, transform_indices = @transform_1, window_bounds = array<i64: 8, 128>}, {pipeline_mode = #tpu.pipeline_mode<synchronous>, transform_indices = @transform_2, window_bounds = array<i64: 128, 256>}, {pipeline_mode = #tpu.pipeline_mode<synchronous>, transform_indices = @transform_3, window_bounds = array<i64: 128, 128>}, {transform_indices = @transform_4, window_bounds = array<i64: 8, 8, 128>}]} {
    %c0_i32 = arith.constant 0 : i32
    %0 = arith.cmpi eq, %arg0, %c0_i32 : i32
    %1 = arith.extui %0 : i1 to i32
    %c0_i32_0 = arith.constant 0 : i32
    %2 = arith.cmpi ne, %1, %c0_i32_0 : i32
    scf.if %2 {
      %c0_80 = arith.constant 0 : index
      %c0_81 = arith.constant 0 : index
      %303 = vector.load %arg2[%c0_80, %c0_81] : memref<8x128xf32, #tpu.memory_space<vmem>>, vector<8x128xf32>
      %c0_82 = arith.constant 0 : index
      %c0_83 = arith.constant 0 : index
      %304 = vector.load %arg6[%c0_82, %c0_83] : memref<8x128xf32, #tpu.memory_space<vmem>>, vector<8x128xf32>
      tpu.vector_store %arg6[%c0_82, %c0_83], %303 {strides = array<i32>} : memref<8x128xf32, #tpu.memory_space<vmem>>, vector<8x128xf32>,
    } else {
    }
    %c0 = arith.constant 0 : index
    %c0_1 = arith.constant 0 : index
    %3 = vector.load %arg3[%c0, %c0_1] : memref<128x256xbf16, #tpu.memory_space<vmem>>, vector<128x256xbf16>
    %c0_2 = arith.constant 0 : index
    %c0_3 = arith.constant 0 : index
    %4 = vector.load %arg4[%c0_2, %c0_3] : memref<128x128xbf16, #tpu.memory_space<vmem>>, vector<128x128xbf16>
    %c0_4 = arith.constant 0 : index
    %c0_5 = arith.constant 0 : index
    %5 = vector.load %arg6[%c0_4, %c0_5] : memref<8x128xf32, #tpu.memory_space<vmem>>, vector<8x128xf32>
    %c0_i32_6 = arith.constant 0 : i32
    %6 = arith.index_cast %c0_i32_6 : i32 to index
    %c0_7 = arith.constant 0 : index
    %c0_8 = arith.constant 0 : index
    %7 = vector.load %arg1[%6, %c0_7, %c0_8] : memref<8x8x384xbf16, #tpu.memory_space<vmem>>, vector<1x8x384xbf16>
    %8 = vector.shape_cast %7 : vector<1x8x384xbf16> to vector<8x384xbf16>
    %9 = arith.extf %8 : vector<8x384xbf16> to vector<8x384xf32>
    %10 = arith.truncf %5 : vector<8x128xf32> to vector<8x128xbf16>
    %cst = arith.constant dense<0.000000e+00> : vector<8x256xf32>
    %11 = tpu.matmul %10, %3, %cst {dimension_numbers = #tpu.dot_dimension_numbers<[1], [0], [0], [1], [0, 0, 1, 1], [], []>} : vector<8x128xbf16>, vector<128x256xbf16>, vector<8x256xf32> -> vector<8x256xf32>
    %12 = vector.extract_strided_slice %9 {offsets = [0, 0], sizes = [8, 128], strides = [1, 1]} : vector<8x384xf32> to vector<8x128xf32>
    %13 = vector.extract_strided_slice %11 {offsets = [0, 0], sizes = [8, 128], strides = [1, 1]} : vector<8x256xf32> to vector<8x128xf32>
    %14 = arith.addf %12, %13 : vector<8x128xf32>
    %15 = arith.negf %14 : vector<8x128xf32>
    %16 = math.exp %15 : vector<8x128xf32>
    %cst_9 = arith.constant 1.000000e+00 : f32
    %17 = vector.broadcast %cst_9 : f32 to vector<8x128xf32>
    %18 = arith.addf %17, %16 : vector<8x128xf32>
    %19 = arith.divf %17, %18 : vector<8x128xf32>
    %20 = vector.extract_strided_slice %9 {offsets = [0, 128], sizes = [8, 128], strides = [1, 1]} : vector<8x384xf32> to vector<8x128xf32>
    %21 = vector.extract_strided_slice %11 {offsets = [0, 128], sizes = [8, 128], strides = [1, 1]} : vector<8x256xf32> to vector<8x128xf32>
    %22 = arith.addf %20, %21 : vector<8x128xf32>
    %23 = arith.negf %22 : vector<8x128xf32>
    %24 = math.exp %23 : vector<8x128xf32>
    %cst_10 = arith.constant 1.000000e+00 : f32
    %25 = vector.broadcast %cst_10 : f32 to vector<8x128xf32>
    %26 = arith.addf %25, %24 : vector<8x128xf32>
    %27 = arith.divf %25, %26 : vector<8x128xf32>
    %28 = vector.extract_strided_slice %9 {offsets = [0, 256], sizes = [8, 128], strides = [1, 1]} : vector<8x384xf32> to vector<8x128xf32>
    %29 = arith.mulf %19, %5 : vector<8x128xf32>
    %30 = arith.truncf %29 : vector<8x128xf32> to vector<8x128xbf16>
    %cst_11 = arith.constant dense<0.000000e+00> : vector<8x128xf32>
    %31 = tpu.matmul %30, %4, %cst_11 {dimension_numbers = #tpu.dot_dimension_numbers<[1], [0], [0], [1], [0, 0, 1, 1], [], []>} : vector<8x128xbf16>, vector<128x128xbf16>, vector<8x128xf32> -> vector<8x128xf32>
    %32 = arith.addf %28, %31 : vector<8x128xf32>
    %33 = math.tanh %32 : vector<8x128xf32>
    %34 = arith.mulf %27, %5 : vector<8x128xf32>
    %cst_12 = arith.constant 1.000000e+00 : f32
    %35 = vector.broadcast %cst_12 : f32 to vector<8x128xf32>
    %36 = arith.subf %35, %27 : vector<8x128xf32>
    %37 = arith.mulf %36, %33 : vector<8x128xf32>
    %38 = arith.addf %34, %37 : vector<8x128xf32>
    %39 = arith.index_cast %c0_i32_6 : i32 to index
    %c0_13 = arith.constant 0 : index
    %c0_14 = arith.constant 0 : index
    %40 = vector.load %arg5[%39, %c0_13, %c0_14] : memref<8x8x128xf32, #tpu.memory_space<vmem>>, vector<1x8x128xf32>
    %41 = vector.shape_cast %40 : vector<1x8x128xf32> to vector<8x128xf32>
    %42 = vector.shape_cast %38 : vector<8x128xf32> to vector<1x8x128xf32>
    tpu.vector_store %arg5[%39, %c0_13, %c0_14], %42 {strides = array<i32>} : memref<8x8x128xf32, #tpu.memory_space<vmem>>, vector<1x8x128xf32>,
    %c1_i32 = arith.constant 1 : i32
    %43 = arith.index_cast %c1_i32 : i32 to index
    %c0_15 = arith.constant 0 : index
    %c0_16 = arith.constant 0 : index
    %44 = vector.load %arg1[%43, %c0_15, %c0_16] : memref<8x8x384xbf16, #tpu.memory_space<vmem>>, vector<1x8x384xbf16>
    %45 = vector.shape_cast %44 : vector<1x8x384xbf16> to vector<8x384xbf16>
    %46 = arith.extf %45 : vector<8x384xbf16> to vector<8x384xf32>
    %47 = arith.truncf %38 : vector<8x128xf32> to vector<8x128xbf16>
    %cst_17 = arith.constant dense<0.000000e+00> : vector<8x256xf32>
    %48 = tpu.matmul %47, %3, %cst_17 {dimension_numbers = #tpu.dot_dimension_numbers<[1], [0], [0], [1], [0, 0, 1, 1], [], []>} : vector<8x128xbf16>, vector<128x256xbf16>, vector<8x256xf32> -> vector<8x256xf32>
    %49 = vector.extract_strided_slice %46 {offsets = [0, 0], sizes = [8, 128], strides = [1, 1]} : vector<8x384xf32> to vector<8x128xf32>
    %50 = vector.extract_strided_slice %48 {offsets = [0, 0], sizes = [8, 128], strides = [1, 1]} : vector<8x256xf32> to vector<8x128xf32>
    %51 = arith.addf %49, %50 : vector<8x128xf32>
    %52 = arith.negf %51 : vector<8x128xf32>
    %53 = math.exp %52 : vector<8x128xf32>
    %cst_18 = arith.constant 1.000000e+00 : f32
    %54 = vector.broadcast %cst_18 : f32 to vector<8x128xf32>
    %55 = arith.addf %54, %53 : vector<8x128xf32>
    %56 = arith.divf %54, %55 : vector<8x128xf32>
    %57 = vector.extract_strided_slice %46 {offsets = [0, 128], sizes = [8, 128], strides = [1, 1]} : vector<8x384xf32> to vector<8x128xf32>
    %58 = vector.extract_strided_slice %48 {offsets = [0, 128], sizes = [8, 128], strides = [1, 1]} : vector<8x256xf32> to vector<8x128xf32>
    %59 = arith.addf %57, %58 : vector<8x128xf32>
    %60 = arith.negf %59 : vector<8x128xf32>
    %61 = math.exp %60 : vector<8x128xf32>
    %cst_19 = arith.constant 1.000000e+00 : f32
    %62 = vector.broadcast %cst_19 : f32 to vector<8x128xf32>
    %63 = arith.addf %62, %61 : vector<8x128xf32>
    %64 = arith.divf %62, %63 : vector<8x128xf32>
    %65 = vector.extract_strided_slice %46 {offsets = [0, 256], sizes = [8, 128], strides = [1, 1]} : vector<8x384xf32> to vector<8x128xf32>
    %66 = arith.mulf %56, %38 : vector<8x128xf32>
    %67 = arith.truncf %66 : vector<8x128xf32> to vector<8x128xbf16>
    %cst_20 = arith.constant dense<0.000000e+00> : vector<8x128xf32>
    %68 = tpu.matmul %67, %4, %cst_20 {dimension_numbers = #tpu.dot_dimension_numbers<[1], [0], [0], [1], [0, 0, 1, 1], [], []>} : vector<8x128xbf16>, vector<128x128xbf16>, vector<8x128xf32> -> vector<8x128xf32>
    %69 = arith.addf %65, %68 : vector<8x128xf32>
    %70 = math.tanh %69 : vector<8x128xf32>
    %71 = arith.mulf %64, %38 : vector<8x128xf32>
    %cst_21 = arith.constant 1.000000e+00 : f32
    %72 = vector.broadcast %cst_21 : f32 to vector<8x128xf32>
    %73 = arith.subf %72, %64 : vector<8x128xf32>
    %74 = arith.mulf %73, %70 : vector<8x128xf32>
    %75 = arith.addf %71, %74 : vector<8x128xf32>
    %76 = arith.index_cast %c1_i32 : i32 to index
    %c0_22 = arith.constant 0 : index
    %c0_23 = arith.constant 0 : index
    %77 = vector.load %arg5[%76, %c0_22, %c0_23] : memref<8x8x128xf32, #tpu.memory_space<vmem>>, vector<1x8x128xf32>
    %78 = vector.shape_cast %77 : vector<1x8x128xf32> to vector<8x128xf32>
    %79 = vector.shape_cast %75 : vector<8x128xf32> to vector<1x8x128xf32>
    tpu.vector_store %arg5[%76, %c0_22, %c0_23], %79 {strides = array<i32>} : memref<8x8x128xf32, #tpu.memory_space<vmem>>, vector<1x8x128xf32>,
    %c2_i32 = arith.constant 2 : i32
    %80 = arith.index_cast %c2_i32 : i32 to index
    %c0_24 = arith.constant 0 : index
    %c0_25 = arith.constant 0 : index
    %81 = vector.load %arg1[%80, %c0_24, %c0_25] : memref<8x8x384xbf16, #tpu.memory_space<vmem>>, vector<1x8x384xbf16>
    %82 = vector.shape_cast %81 : vector<1x8x384xbf16> to vector<8x384xbf16>
    %83 = arith.extf %82 : vector<8x384xbf16> to vector<8x384xf32>
    %84 = arith.truncf %75 : vector<8x128xf32> to vector<8x128xbf16>
    %cst_26 = arith.constant dense<0.000000e+00> : vector<8x256xf32>
    %85 = tpu.matmul %84, %3, %cst_26 {dimension_numbers = #tpu.dot_dimension_numbers<[1], [0], [0], [1], [0, 0, 1, 1], [], []>} : vector<8x128xbf16>, vector<128x256xbf16>, vector<8x256xf32> -> vector<8x256xf32>
    %86 = vector.extract_strided_slice %83 {offsets = [0, 0], sizes = [8, 128], strides = [1, 1]} : vector<8x384xf32> to vector<8x128xf32>
    %87 = vector.extract_strided_slice %85 {offsets = [0, 0], sizes = [8, 128], strides = [1, 1]} : vector<8x256xf32> to vector<8x128xf32>
    %88 = arith.addf %86, %87 : vector<8x128xf32>
    %89 = arith.negf %88 : vector<8x128xf32>
    %90 = math.exp %89 : vector<8x128xf32>
    %cst_27 = arith.constant 1.000000e+00 : f32
    %91 = vector.broadcast %cst_27 : f32 to vector<8x128xf32>
    %92 = arith.addf %91, %90 : vector<8x128xf32>
    %93 = arith.divf %91, %92 : vector<8x128xf32>
    %94 = vector.extract_strided_slice %83 {offsets = [0, 128], sizes = [8, 128], strides = [1, 1]} : vector<8x384xf32> to vector<8x128xf32>
    %95 = vector.extract_strided_slice %85 {offsets = [0, 128], sizes = [8, 128], strides = [1, 1]} : vector<8x256xf32> to vector<8x128xf32>
    %96 = arith.addf %94, %95 : vector<8x128xf32>
    %97 = arith.negf %96 : vector<8x128xf32>
    %98 = math.exp %97 : vector<8x128xf32>
    %cst_28 = arith.constant 1.000000e+00 : f32
    %99 = vector.broadcast %cst_28 : f32 to vector<8x128xf32>
    %100 = arith.addf %99, %98 : vector<8x128xf32>
    %101 = arith.divf %99, %100 : vector<8x128xf32>
    %102 = vector.extract_strided_slice %83 {offsets = [0, 256], sizes = [8, 128], strides = [1, 1]} : vector<8x384xf32> to vector<8x128xf32>
    %103 = arith.mulf %93, %75 : vector<8x128xf32>
    %104 = arith.truncf %103 : vector<8x128xf32> to vector<8x128xbf16>
    %cst_29 = arith.constant dense<0.000000e+00> : vector<8x128xf32>
    %105 = tpu.matmul %104, %4, %cst_29 {dimension_numbers = #tpu.dot_dimension_numbers<[1], [0], [0], [1], [0, 0, 1, 1], [], []>} : vector<8x128xbf16>, vector<128x128xbf16>, vector<8x128xf32> -> vector<8x128xf32>
    %106 = arith.addf %102, %105 : vector<8x128xf32>
    %107 = math.tanh %106 : vector<8x128xf32>
    %108 = arith.mulf %101, %75 : vector<8x128xf32>
    %cst_30 = arith.constant 1.000000e+00 : f32
    %109 = vector.broadcast %cst_30 : f32 to vector<8x128xf32>
    %110 = arith.subf %109, %101 : vector<8x128xf32>
    %111 = arith.mulf %110, %107 : vector<8x128xf32>
    %112 = arith.addf %108, %111 : vector<8x128xf32>
    %113 = arith.index_cast %c2_i32 : i32 to index
    %c0_31 = arith.constant 0 : index
    %c0_32 = arith.constant 0 : index
    %114 = vector.load %arg5[%113, %c0_31, %c0_32] : memref<8x8x128xf32, #tpu.memory_space<vmem>>, vector<1x8x128xf32>
    %115 = vector.shape_cast %114 : vector<1x8x128xf32> to vector<8x128xf32>
    %116 = vector.shape_cast %112 : vector<8x128xf32> to vector<1x8x128xf32>
    tpu.vector_store %arg5[%113, %c0_31, %c0_32], %116 {strides = array<i32>} : memref<8x8x128xf32, #tpu.memory_space<vmem>>, vector<1x8x128xf32>,
    %c3_i32 = arith.constant 3 : i32
    %117 = arith.index_cast %c3_i32 : i32 to index
    %c0_33 = arith.constant 0 : index
    %c0_34 = arith.constant 0 : index
    %118 = vector.load %arg1[%117, %c0_33, %c0_34] : memref<8x8x384xbf16, #tpu.memory_space<vmem>>, vector<1x8x384xbf16>
    %119 = vector.shape_cast %118 : vector<1x8x384xbf16> to vector<8x384xbf16>
    %120 = arith.extf %119 : vector<8x384xbf16> to vector<8x384xf32>
    %121 = arith.truncf %112 : vector<8x128xf32> to vector<8x128xbf16>
    %cst_35 = arith.constant dense<0.000000e+00> : vector<8x256xf32>
    %122 = tpu.matmul %121, %3, %cst_35 {dimension_numbers = #tpu.dot_dimension_numbers<[1], [0], [0], [1], [0, 0, 1, 1], [], []>} : vector<8x128xbf16>, vector<128x256xbf16>, vector<8x256xf32> -> vector<8x256xf32>
    %123 = vector.extract_strided_slice %120 {offsets = [0, 0], sizes = [8, 128], strides = [1, 1]} : vector<8x384xf32> to vector<8x128xf32>
    %124 = vector.extract_strided_slice %122 {offsets = [0, 0], sizes = [8, 128], strides = [1, 1]} : vector<8x256xf32> to vector<8x128xf32>
    %125 = arith.addf %123, %124 : vector<8x128xf32>
    %126 = arith.negf %125 : vector<8x128xf32>
    %127 = math.exp %126 : vector<8x128xf32>
    %cst_36 = arith.constant 1.000000e+00 : f32
    %128 = vector.broadcast %cst_36 : f32 to vector<8x128xf32>
    %129 = arith.addf %128, %127 : vector<8x128xf32>
    %130 = arith.divf %128, %129 : vector<8x128xf32>
    %131 = vector.extract_strided_slice %120 {offsets = [0, 128], sizes = [8, 128], strides = [1, 1]} : vector<8x384xf32> to vector<8x128xf32>
    %132 = vector.extract_strided_slice %122 {offsets = [0, 128], sizes = [8, 128], strides = [1, 1]} : vector<8x256xf32> to vector<8x128xf32>
    %133 = arith.addf %131, %132 : vector<8x128xf32>
    %134 = arith.negf %133 : vector<8x128xf32>
    %135 = math.exp %134 : vector<8x128xf32>
    %cst_37 = arith.constant 1.000000e+00 : f32
    %136 = vector.broadcast %cst_37 : f32 to vector<8x128xf32>
    %137 = arith.addf %136, %135 : vector<8x128xf32>
    %138 = arith.divf %136, %137 : vector<8x128xf32>
    %139 = vector.extract_strided_slice %120 {offsets = [0, 256], sizes = [8, 128], strides = [1, 1]} : vector<8x384xf32> to vector<8x128xf32>
    %140 = arith.mulf %130, %112 : vector<8x128xf32>
    %141 = arith.truncf %140 : vector<8x128xf32> to vector<8x128xbf16>
    %cst_38 = arith.constant dense<0.000000e+00> : vector<8x128xf32>
    %142 = tpu.matmul %141, %4, %cst_38 {dimension_numbers = #tpu.dot_dimension_numbers<[1], [0], [0], [1], [0, 0, 1, 1], [], []>} : vector<8x128xbf16>, vector<128x128xbf16>, vector<8x128xf32> -> vector<8x128xf32>
    %143 = arith.addf %139, %142 : vector<8x128xf32>
    %144 = math.tanh %143 : vector<8x128xf32>
    %145 = arith.mulf %138, %112 : vector<8x128xf32>
    %cst_39 = arith.constant 1.000000e+00 : f32
    %146 = vector.broadcast %cst_39 : f32 to vector<8x128xf32>
    %147 = arith.subf %146, %138 : vector<8x128xf32>
    %148 = arith.mulf %147, %144 : vector<8x128xf32>
    %149 = arith.addf %145, %148 : vector<8x128xf32>
    %150 = arith.index_cast %c3_i32 : i32 to index
    %c0_40 = arith.constant 0 : index
    %c0_41 = arith.constant 0 : index
    %151 = vector.load %arg5[%150, %c0_40, %c0_41] : memref<8x8x128xf32, #tpu.memory_space<vmem>>, vector<1x8x128xf32>
    %152 = vector.shape_cast %151 : vector<1x8x128xf32> to vector<8x128xf32>
    %153 = vector.shape_cast %149 : vector<8x128xf32> to vector<1x8x128xf32>
    tpu.vector_store %arg5[%150, %c0_40, %c0_41], %153 {strides = array<i32>} : memref<8x8x128xf32, #tpu.memory_space<vmem>>, vector<1x8x128xf32>,
    %c4_i32 = arith.constant 4 : i32
    %154 = arith.index_cast %c4_i32 : i32 to index
    %c0_42 = arith.constant 0 : index
    %c0_43 = arith.constant 0 : index
    %155 = vector.load %arg1[%154, %c0_42, %c0_43] : memref<8x8x384xbf16, #tpu.memory_space<vmem>>, vector<1x8x384xbf16>
    %156 = vector.shape_cast %155 : vector<1x8x384xbf16> to vector<8x384xbf16>
    %157 = arith.extf %156 : vector<8x384xbf16> to vector<8x384xf32>
    %158 = arith.truncf %149 : vector<8x128xf32> to vector<8x128xbf16>
    %cst_44 = arith.constant dense<0.000000e+00> : vector<8x256xf32>
    %159 = tpu.matmul %158, %3, %cst_44 {dimension_numbers = #tpu.dot_dimension_numbers<[1], [0], [0], [1], [0, 0, 1, 1], [], []>} : vector<8x128xbf16>, vector<128x256xbf16>, vector<8x256xf32> -> vector<8x256xf32>
    %160 = vector.extract_strided_slice %157 {offsets = [0, 0], sizes = [8, 128], strides = [1, 1]} : vector<8x384xf32> to vector<8x128xf32>
    %161 = vector.extract_strided_slice %159 {offsets = [0, 0], sizes = [8, 128], strides = [1, 1]} : vector<8x256xf32> to vector<8x128xf32>
    %162 = arith.addf %160, %161 : vector<8x128xf32>
    %163 = arith.negf %162 : vector<8x128xf32>
    %164 = math.exp %163 : vector<8x128xf32>
    %cst_45 = arith.constant 1.000000e+00 : f32
    %165 = vector.broadcast %cst_45 : f32 to vector<8x128xf32>
    %166 = arith.addf %165, %164 : vector<8x128xf32>
    %167 = arith.divf %165, %166 : vector<8x128xf32>
    %168 = vector.extract_strided_slice %157 {offsets = [0, 128], sizes = [8, 128], strides = [1, 1]} : vector<8x384xf32> to vector<8x128xf32>
    %169 = vector.extract_strided_slice %159 {offsets = [0, 128], sizes = [8, 128], strides = [1, 1]} : vector<8x256xf32> to vector<8x128xf32>
    %170 = arith.addf %168, %169 : vector<8x128xf32>
    %171 = arith.negf %170 : vector<8x128xf32>
    %172 = math.exp %171 : vector<8x128xf32>
    %cst_46 = arith.constant 1.000000e+00 : f32
    %173 = vector.broadcast %cst_46 : f32 to vector<8x128xf32>
    %174 = arith.addf %173, %172 : vector<8x128xf32>
    %175 = arith.divf %173, %174 : vector<8x128xf32>
    %176 = vector.extract_strided_slice %157 {offsets = [0, 256], sizes = [8, 128], strides = [1, 1]} : vector<8x384xf32> to vector<8x128xf32>
    %177 = arith.mulf %167, %149 : vector<8x128xf32>
    %178 = arith.truncf %177 : vector<8x128xf32> to vector<8x128xbf16>
    %cst_47 = arith.constant dense<0.000000e+00> : vector<8x128xf32>
    %179 = tpu.matmul %178, %4, %cst_47 {dimension_numbers = #tpu.dot_dimension_numbers<[1], [0], [0], [1], [0, 0, 1, 1], [], []>} : vector<8x128xbf16>, vector<128x128xbf16>, vector<8x128xf32> -> vector<8x128xf32>
    %180 = arith.addf %176, %179 : vector<8x128xf32>
    %181 = math.tanh %180 : vector<8x128xf32>
    %182 = arith.mulf %175, %149 : vector<8x128xf32>
    %cst_48 = arith.constant 1.000000e+00 : f32
    %183 = vector.broadcast %cst_48 : f32 to vector<8x128xf32>
    %184 = arith.subf %183, %175 : vector<8x128xf32>
    %185 = arith.mulf %184, %181 : vector<8x128xf32>
    %186 = arith.addf %182, %185 : vector<8x128xf32>
    %187 = arith.index_cast %c4_i32 : i32 to index
    %c0_49 = arith.constant 0 : index
    %c0_50 = arith.constant 0 : index
    %188 = vector.load %arg5[%187, %c0_49, %c0_50] : memref<8x8x128xf32, #tpu.memory_space<vmem>>, vector<1x8x128xf32>
    %189 = vector.shape_cast %188 : vector<1x8x128xf32> to vector<8x128xf32>
    %190 = vector.shape_cast %186 : vector<8x128xf32> to vector<1x8x128xf32>
    tpu.vector_store %arg5[%187, %c0_49, %c0_50], %190 {strides = array<i32>} : memref<8x8x128xf32, #tpu.memory_space<vmem>>, vector<1x8x128xf32>,
    %c5_i32 = arith.constant 5 : i32
    %191 = arith.index_cast %c5_i32 : i32 to index
    %c0_51 = arith.constant 0 : index
    %c0_52 = arith.constant 0 : index
    %192 = vector.load %arg1[%191, %c0_51, %c0_52] : memref<8x8x384xbf16, #tpu.memory_space<vmem>>, vector<1x8x384xbf16>
    %193 = vector.shape_cast %192 : vector<1x8x384xbf16> to vector<8x384xbf16>
    %194 = arith.extf %193 : vector<8x384xbf16> to vector<8x384xf32>
    %195 = arith.truncf %186 : vector<8x128xf32> to vector<8x128xbf16>
    %cst_53 = arith.constant dense<0.000000e+00> : vector<8x256xf32>
    %196 = tpu.matmul %195, %3, %cst_53 {dimension_numbers = #tpu.dot_dimension_numbers<[1], [0], [0], [1], [0, 0, 1, 1], [], []>} : vector<8x128xbf16>, vector<128x256xbf16>, vector<8x256xf32> -> vector<8x256xf32>
    %197 = vector.extract_strided_slice %194 {offsets = [0, 0], sizes = [8, 128], strides = [1, 1]} : vector<8x384xf32> to vector<8x128xf32>
    %198 = vector.extract_strided_slice %196 {offsets = [0, 0], sizes = [8, 128], strides = [1, 1]} : vector<8x256xf32> to vector<8x128xf32>
    %199 = arith.addf %197, %198 : vector<8x128xf32>
    %200 = arith.negf %199 : vector<8x128xf32>
    %201 = math.exp %200 : vector<8x128xf32>
    %cst_54 = arith.constant 1.000000e+00 : f32
    %202 = vector.broadcast %cst_54 : f32 to vector<8x128xf32>
    %203 = arith.addf %202, %201 : vector<8x128xf32>
    %204 = arith.divf %202, %203 : vector<8x128xf32>
    %205 = vector.extract_strided_slice %194 {offsets = [0, 128], sizes = [8, 128], strides = [1, 1]} : vector<8x384xf32> to vector<8x128xf32>
    %206 = vector.extract_strided_slice %196 {offsets = [0, 128], sizes = [8, 128], strides = [1, 1]} : vector<8x256xf32> to vector<8x128xf32>
    %207 = arith.addf %205, %206 : vector<8x128xf32>
    %208 = arith.negf %207 : vector<8x128xf32>
    %209 = math.exp %208 : vector<8x128xf32>
    %cst_55 = arith.constant 1.000000e+00 : f32
    %210 = vector.broadcast %cst_55 : f32 to vector<8x128xf32>
    %211 = arith.addf %210, %209 : vector<8x128xf32>
    %212 = arith.divf %210, %211 : vector<8x128xf32>
    %213 = vector.extract_strided_slice %194 {offsets = [0, 256], sizes = [8, 128], strides = [1, 1]} : vector<8x384xf32> to vector<8x128xf32>
    %214 = arith.mulf %204, %186 : vector<8x128xf32>
    %215 = arith.truncf %214 : vector<8x128xf32> to vector<8x128xbf16>
    %cst_56 = arith.constant dense<0.000000e+00> : vector<8x128xf32>
    %216 = tpu.matmul %215, %4, %cst_56 {dimension_numbers = #tpu.dot_dimension_numbers<[1], [0], [0], [1], [0, 0, 1, 1], [], []>} : vector<8x128xbf16>, vector<128x128xbf16>, vector<8x128xf32> -> vector<8x128xf32>
    %217 = arith.addf %213, %216 : vector<8x128xf32>
    %218 = math.tanh %217 : vector<8x128xf32>
    %219 = arith.mulf %212, %186 : vector<8x128xf32>
    %cst_57 = arith.constant 1.000000e+00 : f32
    %220 = vector.broadcast %cst_57 : f32 to vector<8x128xf32>
    %221 = arith.subf %220, %212 : vector<8x128xf32>
    %222 = arith.mulf %221, %218 : vector<8x128xf32>
    %223 = arith.addf %219, %222 : vector<8x128xf32>
    %224 = arith.index_cast %c5_i32 : i32 to index
    %c0_58 = arith.constant 0 : index
    %c0_59 = arith.constant 0 : index
    %225 = vector.load %arg5[%224, %c0_58, %c0_59] : memref<8x8x128xf32, #tpu.memory_space<vmem>>, vector<1x8x128xf32>
    %226 = vector.shape_cast %225 : vector<1x8x128xf32> to vector<8x128xf32>
    %227 = vector.shape_cast %223 : vector<8x128xf32> to vector<1x8x128xf32>
    tpu.vector_store %arg5[%224, %c0_58, %c0_59], %227 {strides = array<i32>} : memref<8x8x128xf32, #tpu.memory_space<vmem>>, vector<1x8x128xf32>,
    %c6_i32 = arith.constant 6 : i32
    %228 = arith.index_cast %c6_i32 : i32 to index
    %c0_60 = arith.constant 0 : index
    %c0_61 = arith.constant 0 : index
    %229 = vector.load %arg1[%228, %c0_60, %c0_61] : memref<8x8x384xbf16, #tpu.memory_space<vmem>>, vector<1x8x384xbf16>
    %230 = vector.shape_cast %229 : vector<1x8x384xbf16> to vector<8x384xbf16>
    %231 = arith.extf %230 : vector<8x384xbf16> to vector<8x384xf32>
    %232 = arith.truncf %223 : vector<8x128xf32> to vector<8x128xbf16>
    %cst_62 = arith.constant dense<0.000000e+00> : vector<8x256xf32>
    %233 = tpu.matmul %232, %3, %cst_62 {dimension_numbers = #tpu.dot_dimension_numbers<[1], [0], [0], [1], [0, 0, 1, 1], [], []>} : vector<8x128xbf16>, vector<128x256xbf16>, vector<8x256xf32> -> vector<8x256xf32>
    %234 = vector.extract_strided_slice %231 {offsets = [0, 0], sizes = [8, 128], strides = [1, 1]} : vector<8x384xf32> to vector<8x128xf32>
    %235 = vector.extract_strided_slice %233 {offsets = [0, 0], sizes = [8, 128], strides = [1, 1]} : vector<8x256xf32> to vector<8x128xf32>
    %236 = arith.addf %234, %235 : vector<8x128xf32>
    %237 = arith.negf %236 : vector<8x128xf32>
    %238 = math.exp %237 : vector<8x128xf32>
    %cst_63 = arith.constant 1.000000e+00 : f32
    %239 = vector.broadcast %cst_63 : f32 to vector<8x128xf32>
    %240 = arith.addf %239, %238 : vector<8x128xf32>
    %241 = arith.divf %239, %240 : vector<8x128xf32>
    %242 = vector.extract_strided_slice %231 {offsets = [0, 128], sizes = [8, 128], strides = [1, 1]} : vector<8x384xf32> to vector<8x128xf32>
    %243 = vector.extract_strided_slice %233 {offsets = [0, 128], sizes = [8, 128], strides = [1, 1]} : vector<8x256xf32> to vector<8x128xf32>
    %244 = arith.addf %242, %243 : vector<8x128xf32>
    %245 = arith.negf %244 : vector<8x128xf32>
    %246 = math.exp %245 : vector<8x128xf32>
    %cst_64 = arith.constant 1.000000e+00 : f32
    %247 = vector.broadcast %cst_64 : f32 to vector<8x128xf32>
    %248 = arith.addf %247, %246 : vector<8x128xf32>
    %249 = arith.divf %247, %248 : vector<8x128xf32>
    %250 = vector.extract_strided_slice %231 {offsets = [0, 256], sizes = [8, 128], strides = [1, 1]} : vector<8x384xf32> to vector<8x128xf32>
    %251 = arith.mulf %241, %223 : vector<8x128xf32>
    %252 = arith.truncf %251 : vector<8x128xf32> to vector<8x128xbf16>
    %cst_65 = arith.constant dense<0.000000e+00> : vector<8x128xf32>
    %253 = tpu.matmul %252, %4, %cst_65 {dimension_numbers = #tpu.dot_dimension_numbers<[1], [0], [0], [1], [0, 0, 1, 1], [], []>} : vector<8x128xbf16>, vector<128x128xbf16>, vector<8x128xf32> -> vector<8x128xf32>
    %254 = arith.addf %250, %253 : vector<8x128xf32>
    %255 = math.tanh %254 : vector<8x128xf32>
    %256 = arith.mulf %249, %223 : vector<8x128xf32>
    %cst_66 = arith.constant 1.000000e+00 : f32
    %257 = vector.broadcast %cst_66 : f32 to vector<8x128xf32>
    %258 = arith.subf %257, %249 : vector<8x128xf32>
    %259 = arith.mulf %258, %255 : vector<8x128xf32>
    %260 = arith.addf %256, %259 : vector<8x128xf32>
    %261 = arith.index_cast %c6_i32 : i32 to index
    %c0_67 = arith.constant 0 : index
    %c0_68 = arith.constant 0 : index
    %262 = vector.load %arg5[%261, %c0_67, %c0_68] : memref<8x8x128xf32, #tpu.memory_space<vmem>>, vector<1x8x128xf32>
    %263 = vector.shape_cast %262 : vector<1x8x128xf32> to vector<8x128xf32>
    %264 = vector.shape_cast %260 : vector<8x128xf32> to vector<1x8x128xf32>
    tpu.vector_store %arg5[%261, %c0_67, %c0_68], %264 {strides = array<i32>} : memref<8x8x128xf32, #tpu.memory_space<vmem>>, vector<1x8x128xf32>,
    %c7_i32 = arith.constant 7 : i32
    %265 = arith.index_cast %c7_i32 : i32 to index
    %c0_69 = arith.constant 0 : index
    %c0_70 = arith.constant 0 : index
    %266 = vector.load %arg1[%265, %c0_69, %c0_70] : memref<8x8x384xbf16, #tpu.memory_space<vmem>>, vector<1x8x384xbf16>
    %267 = vector.shape_cast %266 : vector<1x8x384xbf16> to vector<8x384xbf16>
    %268 = arith.extf %267 : vector<8x384xbf16> to vector<8x384xf32>
    %269 = arith.truncf %260 : vector<8x128xf32> to vector<8x128xbf16>
    %cst_71 = arith.constant dense<0.000000e+00> : vector<8x256xf32>
    %270 = tpu.matmul %269, %3, %cst_71 {dimension_numbers = #tpu.dot_dimension_numbers<[1], [0], [0], [1], [0, 0, 1, 1], [], []>} : vector<8x128xbf16>, vector<128x256xbf16>, vector<8x256xf32> -> vector<8x256xf32>
    %271 = vector.extract_strided_slice %268 {offsets = [0, 0], sizes = [8, 128], strides = [1, 1]} : vector<8x384xf32> to vector<8x128xf32>
    %272 = vector.extract_strided_slice %270 {offsets = [0, 0], sizes = [8, 128], strides = [1, 1]} : vector<8x256xf32> to vector<8x128xf32>
    %273 = arith.addf %271, %272 : vector<8x128xf32>
    %274 = arith.negf %273 : vector<8x128xf32>
    %275 = math.exp %274 : vector<8x128xf32>
    %cst_72 = arith.constant 1.000000e+00 : f32
    %276 = vector.broadcast %cst_72 : f32 to vector<8x128xf32>
    %277 = arith.addf %276, %275 : vector<8x128xf32>
    %278 = arith.divf %276, %277 : vector<8x128xf32>
    %279 = vector.extract_strided_slice %268 {offsets = [0, 128], sizes = [8, 128], strides = [1, 1]} : vector<8x384xf32> to vector<8x128xf32>
    %280 = vector.extract_strided_slice %270 {offsets = [0, 128], sizes = [8, 128], strides = [1, 1]} : vector<8x256xf32> to vector<8x128xf32>
    %281 = arith.addf %279, %280 : vector<8x128xf32>
    %282 = arith.negf %281 : vector<8x128xf32>
    %283 = math.exp %282 : vector<8x128xf32>
    %cst_73 = arith.constant 1.000000e+00 : f32
    %284 = vector.broadcast %cst_73 : f32 to vector<8x128xf32>
    %285 = arith.addf %284, %283 : vector<8x128xf32>
    %286 = arith.divf %284, %285 : vector<8x128xf32>
    %287 = vector.extract_strided_slice %268 {offsets = [0, 256], sizes = [8, 128], strides = [1, 1]} : vector<8x384xf32> to vector<8x128xf32>
    %288 = arith.mulf %278, %260 : vector<8x128xf32>
    %289 = arith.truncf %288 : vector<8x128xf32> to vector<8x128xbf16>
    %cst_74 = arith.constant dense<0.000000e+00> : vector<8x128xf32>
    %290 = tpu.matmul %289, %4, %cst_74 {dimension_numbers = #tpu.dot_dimension_numbers<[1], [0], [0], [1], [0, 0, 1, 1], [], []>} : vector<8x128xbf16>, vector<128x128xbf16>, vector<8x128xf32> -> vector<8x128xf32>
    %291 = arith.addf %287, %290 : vector<8x128xf32>
    %292 = math.tanh %291 : vector<8x128xf32>
    %293 = arith.mulf %286, %260 : vector<8x128xf32>
    %cst_75 = arith.constant 1.000000e+00 : f32
    %294 = vector.broadcast %cst_75 : f32 to vector<8x128xf32>
    %295 = arith.subf %294, %286 : vector<8x128xf32>
    %296 = arith.mulf %295, %292 : vector<8x128xf32>
    %297 = arith.addf %293, %296 : vector<8x128xf32>
    %298 = arith.index_cast %c7_i32 : i32 to index
    %c0_76 = arith.constant 0 : index
    %c0_77 = arith.constant 0 : index
    %299 = vector.load %arg5[%298, %c0_76, %c0_77] : memref<8x8x128xf32, #tpu.memory_space<vmem>>, vector<1x8x128xf32>
    %300 = vector.shape_cast %299 : vector<1x8x128xf32> to vector<8x128xf32>
    %301 = vector.shape_cast %297 : vector<8x128xf32> to vector<1x8x128xf32>
    tpu.vector_store %arg5[%298, %c0_76, %c0_77], %301 {strides = array<i32>} : memref<8x8x128xf32, #tpu.memory_space<vmem>>, vector<1x8x128xf32>,
    %c8_i32 = arith.constant 8 : i32
    %c0_78 = arith.constant 0 : index
    %c0_79 = arith.constant 0 : index
    %302 = vector.load %arg6[%c0_78, %c0_79] : memref<8x128xf32, #tpu.memory_space<vmem>>, vector<8x128xf32>
    tpu.vector_store %arg6[%c0_78, %c0_79], %297 {strides = array<i32>} : memref<8x128xf32, #tpu.memory_space<vmem>>, vector<8x128xf32>,
    return
  }
  func.func @transform_0(%arg0: i32) -> (i32, i32, i32) {
    %c0_i32 = arith.constant 0 : i32
    %c0_i32_0 = arith.constant 0 : i32
    %c0_i32_1 = arith.constant 0 : i32
    return %arg0, %c0_i32, %c0_i32_0 : i32, i32, i32
  }
  func.func @transform_1(%arg0: i32) -> (i32, i32) {
    %c0_i32 = arith.constant 0 : i32
    %c0_i32_0 = arith.constant 0 : i32
    %c0_i32_1 = arith.constant 0 : i32
    return %c0_i32, %c0_i32_0 : i32, i32
  }
  func.func @transform_2(%arg0: i32) -> (i32, i32) {
    %c0_i32 = arith.constant 0 : i32
    %c0_i32_0 = arith.constant 0 : i32
    %c0_i32_1 = arith.constant 0 : i32
    return %c0_i32, %c0_i32_0 : i32, i32
  }
  func.func @transform_3(%arg0: i32) -> (i32, i32) {
    %c0_i32 = arith.constant 0 : i32
    %c0_i32_0 = arith.constant 0 : i32
    %c0_i32_1 = arith.constant 0 : i32
    return %c0_i32, %c0_i32_0 : i32, i32
  }
  func.func @transform_4(%arg0: i32) -> (i32, i32, i32) {
    %c0_i32 = arith.constant 0 : i32
    %c0_i32_0 = arith.constant 0 : i32
    %c0_i32_1 = arith.constant 0 : i32
    return %arg0, %c0_i32, %c0_i32_0 : i32, i32, i32
  }
}

</mosaic_0001>

<bundles_post_ra>
// kernel: gru_sequence_forward.1
= control target key start
LH: loop header
LB: loop body
LE: loop exit
PB: predicated region body
PF: predicated region fallthrough
CT: control target
= control target key end

     0   :  { %s1796_s15 = smov 0   ;;  %s2316_s0 = inlined_call_operand.vmem [shape: bf16[16,8,384], index: 0, kind: input, shape index: {}]   ;;  %s2317_s1 = inlined_call_operand.vmem [shape: f32[8,128], index: 1, kind: input, shape index: {}]   ;;  %s2318_s2 = inlined_call_operand.vmem [shape: bf16[128,256], index: 2, kind: input, shape index: {}]   ;;  %s2319_s3 = inlined_call_operand.vmem [shape: bf16[128,128], index: 3, kind: input, shape index: {}]   ;;  %s2320_s4 = inlined_call_operand.vmem [shape: f32[16,8,128], index: 4, kind: output, shape index: {}]  }
   0x1 LB: > { %s1323_s16 = sadd.s32 4294967295, %s1766_s15   ;;  %p1327_p0 = scmp.ge.s32.totalorder %s1766_s15, 1  ;;  %s1766_s15 = sphi %s1796_s15, %s14_s15  }
   0x2   : > { %p164_p1 = scmp.lt.s32.totalorder %s1766_s15, 3 }
   0x4   : > { %p165_p2 = pnand %p1327_p0, %p164_p1 }
   0x5   : > { %s1328_s17 = sshll.u32 (!%p165_p2), %s1323_s16, 3  ;;  %p1332_p4 = scmp.ne.s32.totalorder (!%p165_p2), %s1323_s16, 0 }
   0x6   : > { %168 = sbr.rel (%p165_p2) target bundleno = 3852 (0xf0c), region = 36  ;;  %p192_p3 = scmp.lt.s32.totalorder (!%p165_p2), %s1328_s17, 15 }
   0xd   : > { %s2322_s17 = smov (!%p192_p3, %s1328_s17), 15  ;;  %208 = sbr.rel (%p1332_p4) target bundleno = 20 (0x14), region = 40 }
   0xe   : > { %s1628_s18 = smul.u32 12, %s2322_s17  ;;  %s1331_s19 = sshll.u32 %s2322_s17, 3  ;;  %v209_v0 = vld [vmem:[%s2317_s1] sm:$0xff] (!%p1332_p4) }
   0xf   : > { %s1807_s22 = scalar_lea.vmem %s2320_s4, %s1331_s19  ;;  %210 = vst [vmem:[#allocation2] sm:$0xff] (!%p1332_p4), %v209_v0 }
  0x10   : > { %s1812_s25 = scalar_lea.vmem %s2316_s0, %s1628_s18 }
  0x14 PF: > { %v1820_v1 = vld [vmem:[%s2318_s2 + $0x4] ss:$8 sps:$4 sm:$0xff]   ;;  %v1825_v2 = vld [vmem:[%s2318_s2] ss:$8 sps:$4 sm:$0xff]   ;;  %v1768_v3 = vmov 0   ;;  %v1769_v21 = vmov 0.0  }
  0x15   : > { %362 = vmatprep.mubr.bf16.mxu0 %v1768_v3  ;;  %330 = vmatprep.subr.bf16.mxu0 %v1820_v1  ;;  %v1832_v4 = vld [vmem:[%s2318_s2 + $0x14] ss:$8 sps:$4 sm:$0xff]   ;;  %v1838_v5 = vld [vmem:[%s2318_s2 + $0x10] ss:$8 sps:$4 sm:$0xff]   ;;  %v1844_v6 = vld [vmem:[%s2318_s2 + $0x24] ss:$8 sps:$4 sm:$0xff]  }
  0x16   : > { %331 = vmatpush1.bf16.msra.mxu0 %v1825_v2  ;;  %v1850_v7 = vld [vmem:[%s2318_s2 + $0x20] ss:$8 sps:$4 sm:$0xff]   ;;  %v1856_v8 = vld [vmem:[%s2318_s2 + $0x34] ss:$8 sps:$4 sm:$0xff]   ;;  %v1861_v9 = vld [vmem:[%s2318_s2 + $0x30] ss:$8 sps:$4 sm:$0xff]   ;;  %1468 = vmatprep.subr.bf16.mxu1 %v1769_v21 }
  0x17   : > { %332 = vmatprep.subr.bf16.mxu0 %v1832_v4  ;;  %v1867_v10 = vld [vmem:[%s2318_s2 + $0x44] ss:$8 sps:$4 sm:$0xff]   ;;  %v1873_v11 = vld [vmem:[%s2318_s2 + $0x40] ss:$8 sps:$4 sm:$0xff]   ;;  %v1880_v12 = vld [vmem:[%s2318_s2 + $0x54] ss:$8 sps:$4 sm:$0xff]  }
  0x18   : > { %v1886_v13 = vld [vmem:[%s2318_s2 + $0x50] ss:$8 sps:$4 sm:$0xff]   ;;  %v1892_v14 = vld [vmem:[%s2318_s2 + $0x64] ss:$8 sps:$4 sm:$0xff]   ;;  %v1898_v15 = vld [vmem:[%s2318_s2 + $0x60] ss:$8 sps:$4 sm:$0xff]  }
  0x19   : > { %v1904_v16 = vld [vmem:[%s2318_s2 + $0x74] ss:$8 sps:$4 sm:$0xff]   ;;  %v1910_v17 = vld [vmem:[%s2318_s2 + $0x70] ss:$8 sps:$4 sm:$0xff]   ;;  %v1912_v18 = vld [vmem:[#allocation2] sm:$0xff]  ;;  %vm1770_vm0 = vmmov 0  }
  0x1a   : > { %333 = vmatpush1.bf16.msra.mxu0 %v1838_v5  ;;  %v249_v19 = vpack.c.bf16 %v1912_v18, %v1912_v18  ;;  %v1939_v20 = vld [vmem:[%s2319_s3] sm:$0xff]   ;;  %v1947_v22 = vld [vmem:[%s2319_s3 + $0x8] sm:$0xff]   ;;  %v1954_v23 = vld [vmem:[%s2319_s3 + $0x10] sm:$0xff]   ;;  %1484 = vmatprep.mubr.msk.bf16.mxu1 %vm1770_vm0, %v1769_v21 }
  0x1b   : > { %334 = vmatprep.subr.bf16.mxu0 %v1844_v6  ;;  %1469 = vmatpush3.bf16.msra.mxu1 %v1939_v20  ;;  %v1961_v24 = vld [vmem:[%s2319_s3 + $0x18] sm:$0xff]   ;;  %v1968_v25 = vld [vmem:[%s2319_s3 + $0x20] sm:$0xff]   ;;  %v1975_v26 = vld [vmem:[%s2319_s3 + $0x28] sm:$0xff]  }
  0x1c   : > { %1470 = vmatprep.subr.bf16.mxu1 %v1769_v21  ;;  %v1982_v27 = vld [vmem:[%s2319_s3 + $0x30] sm:$0xff]   ;;  %v1989_v28 = vld [vmem:[%s2319_s3 + $0x38] sm:$0xff]   ;;  %v244_v29 = vld [vmem:[%s1812_s25] sm:$0xff] }
  0x1d   : > { %v246_v30 = vunpack.c.l.bf16 %v244_v29  ;;  %v247_v42 = vunpack.c.h.bf16 %v244_v29  ;;  %v2016_v46 = vld [vmem:[%s1812_s25 + $0x8] ss:$12 sps:$4 sm:$0xff]   ;;  %v1359_v61 = vld [vmem:[%s1812_s25 + $0xc] sm:$0xff] }
  0x1e   : > { %335 = vmatpush1.bf16.msra.mxu0 %v1850_v7  ;;  %v248_v48 = vunpack.c.l.bf16 %v2016_v46  ;;  %v485_v62 = vunpack.c.l.bf16 %v1359_v61 }
  0x1f   : > { %336 = vmatprep.subr.bf16.mxu0 %v1856_v8  ;;  %1471 = vmatpush3.bf16.msra.mxu1 %v1947_v22 }
  0x20   : > { %1472 = vmatprep.subr.bf16.mxu1 %v1769_v21 }
  0x22   : > { %337 = vmatpush1.bf16.msra.mxu0 %v1861_v9 }
  0x23   : > { %338 = vmatprep.subr.bf16.mxu0 %v1867_v10  ;;  %1473 = vmatpush3.bf16.msra.mxu1 %v1954_v23 }
  0x24   : > { %1474 = vmatprep.subr.bf16.mxu1 %v1769_v21 }
  0x26   : > { %339 = vmatpush1.bf16.msra.mxu0 %v1873_v11 }
  0x27   : > { %340 = vmatprep.subr.bf16.mxu0 %v1880_v12  ;;  %1475 = vmatpush3.bf16.msra.mxu1 %v1961_v24 }
  0x28   : > { %1476 = vmatprep.subr.bf16.mxu1 %v1769_v21 }
  0x2a   : > { %341 = vmatpush1.bf16.msra.mxu0 %v1886_v13 }
  0x2b   : > { %342 = vmatprep.subr.bf16.mxu0 %v1892_v14  ;;  %1477 = vmatpush3.bf16.msra.mxu1 %v1968_v25 }
  0x2c   : > { %1478 = vmatprep.subr.bf16.mxu1 %v1769_v21 }
  0x2e   : > { %343 = vmatpush1.bf16.msra.mxu0 %v1898_v15 }
  0x2f   : > { %344 = vmatprep.subr.bf16.mxu0 %v1904_v16  ;;  %1479 = vmatpush3.bf16.msra.mxu1 %v1975_v26 }
  0x30   : > { %1480 = vmatprep.subr.bf16.mxu1 %v1769_v21 }
  0x32   : > { %345 = vmatpush1.bf16.msra.mxu0 %v1910_v17 }
  0x33   : > { %489 = vmatprep.subr.bf16.mxu0 %v1820_v1  ;;  %1481 = vmatpush3.bf16.msra.mxu1 %v1982_v27 }
  0x34   : > { %1482 = vmatprep.subr.bf16.mxu1 %v1769_v21 }
  0x35   : > { %363 = vmatmul.mubr.bf16.vlgmr.msra.gmra.mrb[0].mxu0 %v249_v19 }
  0x36   : > { %490 = vmatpush1.bf16.msra.mxu0 %v1825_v2  ;;  %521 = vmatprep.mubr.bf16.mxu0 %v1768_v3 }
  0x37   : > { %491 = vmatprep.subr.bf16.mxu0 %v1832_v4  ;;  %1483 = vmatpush3.bf16.msra.mxu1 %v1989_v28 }
  0x38   : > { %1488 = vmatprep.subr.bf16.mxu1 %v1769_v21 }
  0x3a   : > { %492 = vmatpush1.bf16.msra.mxu0 %v1838_v5 }
  0x3b   : > { %493 = vmatprep.subr.bf16.mxu0 %v1844_v6 }
  0x3e   : > { %494 = vmatpush1.bf16.msra.mxu0 %v1850_v7 }
  0x3f   : > { %495 = vmatprep.subr.bf16.mxu0 %v1856_v8 }
  0x42   : > { %496 = vmatpush1.bf16.msra.mxu0 %v1861_v9 }
  0x43   : > { %497 = vmatprep.subr.bf16.mxu0 %v1867_v10 }
  0x46   : > { %498 = vmatpush1.bf16.msra.mxu0 %v1873_v11 }
  0x47   : > { %499 = vmatprep.subr.bf16.mxu0 %v1880_v12 }
  0x4a   : > { %500 = vmatpush1.bf16.msra.mxu0 %v1886_v13 }
  0x4b   : > { %501 = vmatprep.subr.bf16.mxu0 %v1892_v14 }
  0x4e   : > { %502 = vmatpush1.bf16.msra.mxu0 %v1898_v15 }
  0x4f   : > { %503 = vmatprep.subr.bf16.mxu0 %v1904_v16 }
  0x52   : > { %504 = vmatpush1.bf16.msra.mxu0 %v1910_v17 }
  0x53   : > { %601 = vmatprep.subr.bf16.mxu0 %v1820_v1 }
 0x108   : > { %v364_v31 = vpop.f32.mrb[0].mxu0 }
 0x109   : > { %v371_v32 = vadd.f32 %v364_v31, %v246_v30  ;;  %v366_v33 = vpop.f32.mrb[1].mxu0 }
 0x10a   : > { %v368_v34 = vpop.f32.mrb[2].mxu0  ;;  %v378_v43 = vadd.f32 %v366_v33, %v247_v42 }
 0x10b   : > { %v1349_v35 = vmul.f32 -1.442695, %v371_v32  ;;  %v369_v36 = vpop.f32.mrb[3].mxu0 }
 0x10c   : > { %v1350_v44 = vmul.f32 -1.442695, %v378_v43  ;;  %v486_v36 = vunpack.c.h.bf16 %v1359_v61 }
 0x10d   : > { %1672 = vpow2.f32 %v1349_v35 }
 0x117   : > { %v1673_v37 = vpop.eup %1672 }
 0x118   : > { %v375_v38 = vadd.f32 1.0, %v1673_v37 }
 0x11a   : > { %1674 = vrcp.f32 %v375_v38 }
 0x11b   : > { %1676 = vpow2.f32 %v1350_v44 }
 0x124   : > { %v1675_v39 = vpop.eup %1674 }
 0x125   : > { %v385_v40 = vmul.f32 %v1675_v39, %v1912_v18  ;;  %v1677_v45 = vpop.eup %1676 }
 0x126   : > { %v382_v47 = vadd.f32 1.0, %v1677_v45 }
 0x127   : > { %v386_v41 = vpack.c.bf16 %v385_v40, %v385_v40 }
 0x128   : > { %1678 = vrcp.f32 %v382_v47 }
 0x129   : > { %1485 = vmatmul.mubr.bf16.vlgmr.msra.gmra.mrb[0].mxu1 %v386_v41  ;;  %v487_v41 = vunpack.c.h.bf16 %v2016_v46 }
 0x12a   : > { %1489 = vmatpush3.bf16.msra.mxu1 %v1939_v20  ;;  %1504 = vmatprep.mubr.msk.bf16.mxu1 %vm1770_vm0, %v1769_v21 }
 0x12b   : > { %1490 = vmatprep.subr.bf16.mxu1 %v1769_v21 }
 0x12e   : > { %1491 = vmatpush3.bf16.msra.mxu1 %v1947_v22 }
 0x12f   : > { %1492 = vmatprep.subr.bf16.mxu1 %v1769_v21 }
 0x132   : > { %1493 = vmatpush3.bf16.msra.mxu1 %v1954_v23  ;;  %v1679_v54 = vpop.eup %1678 }
 0x133   : > { %1494 = vmatprep.subr.bf16.mxu1 %v1769_v21  ;;  %v478_v55 = vsub.f32 1.0, %v1679_v54  ;;  %v477_v57 = vmul.f32 %v1679_v54, %v1912_v18  ;;  %v1364_v54 = vld [vmem:[%s1812_s25 + $0x18] sm:$0xff] }
 0x136   : > { %1495 = vmatpush3.bf16.msra.mxu1 %v1961_v24 }
 0x137   : > { %1496 = vmatprep.subr.bf16.mxu1 %v1769_v21 }
 0x13a   : > { %1497 = vmatpush3.bf16.msra.mxu1 %v1968_v25 }
 0x13b   : > { %1498 = vmatprep.subr.bf16.mxu1 %v1769_v21 }
 0x13e   : > { %1499 = vmatpush3.bf16.msra.mxu1 %v1975_v26 }
 0x13f   : > { %1500 = vmatprep.subr.bf16.mxu1 %v1769_v21 }
 0x142   : > { %1501 = vmatpush3.bf16.msra.mxu1 %v1982_v27 }
 0x143   : > { %1502 = vmatprep.subr.bf16.mxu1 %v1769_v21 }
 0x146   : > { %1503 = vmatpush3.bf16.msra.mxu1 %v1989_v28 }
 0x147   : > { %1508 = vmatprep.subr.bf16.mxu1 %v1769_v21 }
 0x1fc   : > { %v469_v49 = vpop.f32.mrb[0].mxu1 }
 0x1fd   : > { %v475_v50 = vadd.f32 %v469_v49, %v248_v48  ;;  %v1486_v51 = vpop.f32.mrb[1].mxu1 }
 0x1fe   : > { %v472_v52 = vpop.f32.mrb[2].mxu1 }
 0x1ff   : > { %1680 = vtanh.f32 %v475_v50  ;;  %v1487_v53 = vpop.f32.mrb[3].mxu1 }
 0x209   : > { %v1681_v56 = vpop.eup %1680 }
 0x20a   : > { %v479_v58 = vmul.f32 %v1681_v56, %v478_v55  ;;  %v597_v55 = vunpack.c.l.bf16 %v1364_v54 }
 0x20c   : > { %v2020_v59 = vadd.f32 %v479_v58, %v477_v57 }
 0x20e   : > { %481 = vst [vmem:[%s1807_s22] sm:$0xff] %v2020_v59  ;;  %v488_v60 = vpack.c.bf16 %v2020_v59, %v2020_v59 }
 0x210   : > { %522 = vmatmul.mubr.bf16.vlgmr.msra.gmra.mrb[4].mxu0 %v488_v60 }
 0x211   : > { %602 = vmatpush1.bf16.msra.mxu0 %v1825_v2  ;;  %633 = vmatprep.mubr.bf16.mxu0 %v1768_v3 }
 0x212   : > { %603 = vmatprep.subr.bf16.mxu0 %v1832_v4 }
 0x215   : > { %604 = vmatpush1.bf16.msra.mxu0 %v1838_v5 }
 0x216   : > { %605 = vmatprep.subr.bf16.mxu0 %v1844_v6 }
 0x219   : > { %606 = vmatpush1.bf16.msra.mxu0 %v1850_v7 }
 0x21a   : > { %607 = vmatprep.subr.bf16.mxu0 %v1856_v8 }
 0x21d   : > { %608 = vmatpush1.bf16.msra.mxu0 %v1861_v9 }
 0x21e   : > { %609 = vmatprep.subr.bf16.mxu0 %v1867_v10 }
 0x221   : > { %610 = vmatpush1.bf16.msra.mxu0 %v1873_v11 }
 0x222   : > { %611 = vmatprep.subr.bf16.mxu0 %v1880_v12 }
 0x225   : > { %612 = vmatpush1.bf16.msra.mxu0 %v1886_v13 }
 0x226   : > { %613 = vmatprep.subr.bf16.mxu0 %v1892_v14 }
 0x229   : > { %614 = vmatpush1.bf16.msra.mxu0 %v1898_v15 }
 0x22a   : > { %615 = vmatprep.subr.bf16.mxu0 %v1904_v16 }
 0x22d   : > { %616 = vmatpush1.bf16.msra.mxu0 %v1910_v17 }
 0x22e   : > { %713 = vmatprep.subr.bf16.mxu0 %v1820_v1 }
 0x2e3   : > { %v523_v63 = vpop.f32.mrb[4].mxu0 }
 0x2e4   : > { %v530_v0 = vadd.f32 %v523_v63, %v485_v62  ;;  %v525_v18 = vpop.f32.mrb[5].mxu0 }
 0x2e5   : > { %v527_v19 = vpop.f32.mrb[6].mxu0  ;;  %v537_v37 = vadd.f32 %v525_v18, %v486_v36 }
 0x2e6   : > { %v1361_v29 = vmul.f32 -1.442695, %v530_v0  ;;  %v528_v30 = vpop.f32.mrb[7].mxu0 }
 0x2e7   : > { %v1362_v38 = vmul.f32 -1.442695, %v537_v37 }
 0x2e8   : > { %1682 = vpow2.f32 %v1361_v29  ;;  %v598_v29 = vunpack.c.h.bf16 %v1364_v54 }
 0x2f2   : > { %v1683_v31 = vpop.eup %1682 }
 0x2f3   : > { %v534_v32 = vadd.f32 1.0, %v1683_v31 }
 0x2f5   : > { %1684 = vrcp.f32 %v534_v32 }
 0x2f6   : > { %1686 = vpow2.f32 %v1362_v38 }
 0x2ff   : > { %v1685_v33 = vpop.eup %1684 }
 0x300   : > { %v544_v34 = vmul.f32 %v1685_v33, %v2020_v59  ;;  %v1687_v39 = vpop.eup %1686  ;;  %v2109_v33 = vld [vmem:[%s1812_s25 + $0x20] ss:$12 sps:$4 sm:$0xff]  }
 0x301   : > { %v541_v40 = vadd.f32 1.0, %v1687_v39 }
 0x302   : > { %v545_v35 = vpack.c.bf16 %v544_v34, %v544_v34 }
 0x303   : > { %1688 = vrcp.f32 %v541_v40 }
 0x304   : > { %1505 = vmatmul.mubr.bf16.vlgmr.msra.gmra.mrb[4].mxu1 %v545_v35  ;;  %v599_v35 = vunpack.c.l.bf16 %v2109_v33 }
 0x305   : > { %1509 = vmatpush3.bf16.msra.mxu1 %v1939_v20  ;;  %1524 = vmatprep.mubr.msk.bf16.mxu1 %vm1770_vm0, %v1769_v21 }
 0x306   : > { %1510 = vmatprep.subr.bf16.mxu1 %v1769_v21 }
 0x309   : > { %1511 = vmatpush3.bf16.msra.mxu1 %v1947_v22 }
 0x30a   : > { %1512 = vmatprep.subr.bf16.mxu1 %v1769_v21 }
 0x30d   : > { %1513 = vmatpush3.bf16.msra.mxu1 %v1954_v23  ;;  %v1689_v48 = vpop.eup %1688 }
 0x30e   : > { %1514 = vmatprep.subr.bf16.mxu1 %v1769_v21  ;;  %v589_v49 = vsub.f32 1.0, %v1689_v48  ;;  %v588_v51 = vmul.f32 %v1689_v48, %v2020_v59 }
 0x311   : > { %1515 = vmatpush3.bf16.msra.mxu1 %v1961_v24 }
 0x312   : > { %1516 = vmatprep.subr.bf16.mxu1 %v1769_v21 }
 0x315   : > { %1517 = vmatpush3.bf16.msra.mxu1 %v1968_v25 }
 0x316   : > { %1518 = vmatprep.subr.bf16.mxu1 %v1769_v21 }
 0x319   : > { %1519 = vmatpush3.bf16.msra.mxu1 %v1975_v26 }
 0x31a   : > { %1520 = vmatprep.subr.bf16.mxu1 %v1769_v21 }
 0x31d   : > { %1521 = vmatpush3.bf16.msra.mxu1 %v1982_v27 }
 0x31e   : > { %1522 = vmatprep.subr.bf16.mxu1 %v1769_v21 }
 0x321   : > { %1523 = vmatpush3.bf16.msra.mxu1 %v1989_v28 }
 0x322   : > { %1528 = vmatprep.subr.bf16.mxu1 %v1769_v21 }
 0x3d7   : > { %v580_v42 = vpop.f32.mrb[4].mxu1 }
 0x3d8   : > { %v586_v43 = vadd.f32 %v580_v42, %v487_v41  ;;  %v1506_v44 = vpop.f32.mrb[5].mxu1 }
 0x3d9   : > { %v583_v45 = vpop.f32.mrb[6].mxu1 }
 0x3da   : > { %1690 = vtanh.f32 %v586_v43  ;;  %v1507_v47 = vpop.f32.mrb[7].mxu1 }
 0x3e4   : > { %v1691_v50 = vpop.eup %1690 }
 0x3e5   : > { %v590_v52 = vmul.f32 %v1691_v50, %v589_v49  ;;  %v1369_v49 = vld [vmem:[%s1812_s25 + $0x24] sm:$0xff] }
 0x3e6   : > { %v709_v50 = vunpack.c.l.bf16 %v1369_v49 }
 0x3e7   : > { %v2065_v53 = vadd.f32 %v590_v52, %v588_v51 }
 0x3e9   : > { %1363 = vst [vmem:[%s1807_s22 + $0x8] sm:$0xff] %v2065_v53  ;;  %v600_v46 = vpack.c.bf16 %v2065_v53, %v2065_v53 }
 0x3eb   : > { %634 = vmatmul.mubr.bf16.vlgmr.msra.gmra.mrb[8].mxu0 %v600_v46 }
 0x3ec   : > { %714 = vmatpush1.bf16.msra.mxu0 %v1825_v2  ;;  %745 = vmatprep.mubr.bf16.mxu0 %v1768_v3 }
 0x3ed   : > { %715 = vmatprep.subr.bf16.mxu0 %v1832_v4 }
 0x3f0   : > { %716 = vmatpush1.bf16.msra.mxu0 %v1838_v5 }
 0x3f1   : > { %717 = vmatprep.subr.bf16.mxu0 %v1844_v6 }
 0x3f4   : > { %718 = vmatpush1.bf16.msra.mxu0 %v1850_v7 }
 0x3f5   : > { %719 = vmatprep.subr.bf16.mxu0 %v1856_v8 }
 0x3f8   : > { %720 = vmatpush1.bf16.msra.mxu0 %v1861_v9 }
 0x3f9   : > { %721 = vmatprep.subr.bf16.mxu0 %v1867_v10 }
 0x3fc   : > { %722 = vmatpush1.bf16.msra.mxu0 %v1873_v11 }
 0x3fd   : > { %723 = vmatprep.subr.bf16.mxu0 %v1880_v12 }
 0x400   : > { %724 = vmatpush1.bf16.msra.mxu0 %v1886_v13 }
 0x401   : > { %725 = vmatprep.subr.bf16.mxu0 %v1892_v14 }
 0x404   : > { %726 = vmatpush1.bf16.msra.mxu0 %v1898_v15 }
 0x405   : > { %727 = vmatprep.subr.bf16.mxu0 %v1904_v16 }
 0x408   : > { %728 = vmatpush1.bf16.msra.mxu0 %v1910_v17 }
 0x409   : > { %825 = vmatprep.subr.bf16.mxu0 %v1820_v1 }
 0x4be   : > { %v635_v56 = vpop.f32.mrb[8].mxu0 }
 0x4bf   : > { %v642_v57 = vadd.f32 %v635_v56, %v597_v55  ;;  %v637_v58 = vpop.f32.mrb[9].mxu0 }
 0x4c0   : > { %v639_v59 = vpop.f32.mrb[10].mxu0  ;;  %v649_v30 = vadd.f32 %v637_v58, %v598_v29 }
 0x4c1   : > { %v1366_v60 = vmul.f32 -1.442695, %v642_v57  ;;  %v640_v61 = vpop.f32.mrb[11].mxu0 }
 0x4c2   : > { %v1367_v31 = vmul.f32 -1.442695, %v649_v30  ;;  %v710_v61 = vunpack.c.h.bf16 %v1369_v49 }
 0x4c3   : > { %1692 = vpow2.f32 %v1366_v60 }
 0x4cd   : > { %v1693_v62 = vpop.eup %1692 }
 0x4ce   : > { %v646_v63 = vadd.f32 1.0, %v1693_v62 }
 0x4d0   : > { %1694 = vrcp.f32 %v646_v63 }
 0x4d1   : > { %1696 = vpow2.f32 %v1367_v31 }
 0x4da   : > { %v1695_v0 = vpop.eup %1694 }
 0x4db   : > { %v656_v18 = vmul.f32 %v1695_v0, %v2065_v53  ;;  %v1697_v32 = vpop.eup %1696 }
 0x4dc   : > { %v653_v34 = vadd.f32 1.0, %v1697_v32 }
 0x4dd   : > { %v657_v19 = vpack.c.bf16 %v656_v18, %v656_v18 }
 0x4de   : > { %1698 = vrcp.f32 %v653_v34 }
 0x4df   : > { %1525 = vmatmul.mubr.bf16.vlgmr.msra.gmra.mrb[8].mxu1 %v657_v19  ;;  %v711_v19 = vunpack.c.h.bf16 %v2109_v33 }
 0x4e0   : > { %1529 = vmatpush3.bf16.msra.mxu1 %v1939_v20  ;;  %1544 = vmatprep.mubr.msk.bf16.mxu1 %vm1770_vm0, %v1769_v21 }
 0x4e1   : > { %1530 = vmatprep.subr.bf16.mxu1 %v1769_v21 }
 0x4e4   : > { %1531 = vmatpush3.bf16.msra.mxu1 %v1947_v22 }
 0x4e5   : > { %1532 = vmatprep.subr.bf16.mxu1 %v1769_v21 }
 0x4e8   : > { %1533 = vmatpush3.bf16.msra.mxu1 %v1954_v23  ;;  %v1699_v41 = vpop.eup %1698 }
 0x4e9   : > { %1534 = vmatprep.subr.bf16.mxu1 %v1769_v21  ;;  %v701_v42 = vsub.f32 1.0, %v1699_v41  ;;  %v700_v44 = vmul.f32 %v1699_v41, %v2065_v53  ;;  %v1374_v41 = vld [vmem:[%s1812_s25 + $0x30] sm:$0xff] }
 0x4ec   : > { %1535 = vmatpush3.bf16.msra.mxu1 %v1961_v24 }
 0x4ed   : > { %1536 = vmatprep.subr.bf16.mxu1 %v1769_v21 }
 0x4f0   : > { %1537 = vmatpush3.bf16.msra.mxu1 %v1968_v25 }
 0x4f1   : > { %1538 = vmatprep.subr.bf16.mxu1 %v1769_v21 }
 0x4f4   : > { %1539 = vmatpush3.bf16.msra.mxu1 %v1975_v26 }
 0x4f5   : > { %1540 = vmatprep.subr.bf16.mxu1 %v1769_v21 }
 0x4f8   : > { %1541 = vmatpush3.bf16.msra.mxu1 %v1982_v27 }
 0x4f9   : > { %1542 = vmatprep.subr.bf16.mxu1 %v1769_v21 }
 0x4fc   : > { %1543 = vmatpush3.bf16.msra.mxu1 %v1989_v28 }
 0x4fd   : > { %1548 = vmatprep.subr.bf16.mxu1 %v1769_v21 }
 0x5b2   : > { %v692_v36 = vpop.f32.mrb[8].mxu1 }
 0x5b3   : > { %v698_v37 = vadd.f32 %v692_v36, %v599_v35  ;;  %v1526_v38 = vpop.f32.mrb[9].mxu1 }
 0x5b4   : > { %v695_v39 = vpop.f32.mrb[10].mxu1 }
 0x5b5   : > { %1700 = vtanh.f32 %v698_v37  ;;  %v1527_v40 = vpop.f32.mrb[11].mxu1 }
 0x5bf   : > { %v1701_v43 = vpop.eup %1700 }
 0x5c0   : > { %v702_v45 = vmul.f32 %v1701_v43, %v701_v42  ;;  %v821_v42 = vunpack.c.l.bf16 %v1374_v41 }
 0x5c2   : > { %v2113_v47 = vadd.f32 %v702_v45, %v700_v44 }
 0x5c4   : > { %1368 = vst [vmem:[%s1807_s22 + $0x10] sm:$0xff] %v2113_v47  ;;  %v712_v48 = vpack.c.bf16 %v2113_v47, %v2113_v47 }
 0x5c6   : > { %746 = vmatmul.mubr.bf16.vlgmr.msra.gmra.mrb[12].mxu0 %v712_v48 }
 0x5c7   : > { %826 = vmatpush1.bf16.msra.mxu0 %v1825_v2  ;;  %857 = vmatprep.mubr.bf16.mxu0 %v1768_v3 }
 0x5c8   : > { %827 = vmatprep.subr.bf16.mxu0 %v1832_v4 }
 0x5cb   : > { %828 = vmatpush1.bf16.msra.mxu0 %v1838_v5 }
 0x5cc   : > { %829 = vmatprep.subr.bf16.mxu0 %v1844_v6 }
 0x5cf   : > { %830 = vmatpush1.bf16.msra.mxu0 %v1850_v7 }
 0x5d0   : > { %831 = vmatprep.subr.bf16.mxu0 %v1856_v8 }
 0x5d3   : > { %832 = vmatpush1.bf16.msra.mxu0 %v1861_v9 }
 0x5d4   : > { %833 = vmatprep.subr.bf16.mxu0 %v1867_v10 }
 0x5d7   : > { %834 = vmatpush1.bf16.msra.mxu0 %v1873_v11 }
 0x5d8   : > { %835 = vmatprep.subr.bf16.mxu0 %v1880_v12 }
 0x5db   : > { %836 = vmatpush1.bf16.msra.mxu0 %v1886_v13 }
 0x5dc   : > { %837 = vmatprep.subr.bf16.mxu0 %v1892_v14 }
 0x5df   : > { %838 = vmatpush1.bf16.msra.mxu0 %v1898_v15 }
 0x5e0   : > { %839 = vmatprep.subr.bf16.mxu0 %v1904_v16 }
 0x5e3   : > { %840 = vmatpush1.bf16.msra.mxu0 %v1910_v17 }
 0x5e4   : > { %937 = vmatprep.subr.bf16.mxu0 %v1820_v1 }
 0x699   : > { %v747_v51 = vpop.f32.mrb[12].mxu0 }
 0x69a   : > { %v754_v52 = vadd.f32 %v747_v51, %v709_v50  ;;  %v749_v53 = vpop.f32.mrb[13].mxu0 }
 0x69b   : > { %v751_v46 = vpop.f32.mrb[14].mxu0  ;;  %v761_v62 = vadd.f32 %v749_v53, %v710_v61 }
 0x69c   : > { %v1371_v54 = vmul.f32 -1.442695, %v754_v52  ;;  %v752_v55 = vpop.f32.mrb[15].mxu0 }
 0x69d   : > { %v1372_v63 = vmul.f32 -1.442695, %v761_v62 }
 0x69e   : > { %1702 = vpow2.f32 %v1371_v54  ;;  %v822_v54 = vunpack.c.h.bf16 %v1374_v41 }
 0x6a8   : > { %v1703_v56 = vpop.eup %1702 }
 0x6a9   : > { %v758_v57 = vadd.f32 1.0, %v1703_v56 }
 0x6ab   : > { %1704 = vrcp.f32 %v758_v57 }
 0x6ac   : > { %1706 = vpow2.f32 %v1372_v63 }
 0x6b5   : > { %v1705_v58 = vpop.eup %1704 }
 0x6b6   : > { %v768_v59 = vmul.f32 %v1705_v58, %v2113_v47  ;;  %v1707_v0 = vpop.eup %1706  ;;  %v2202_v58 = vld [vmem:[%s1812_s25 + $0x38] ss:$12 sps:$4 sm:$0xff]  }
 0x6b7   : > { %v765_v18 = vadd.f32 1.0, %v1707_v0 }
 0x6b8   : > { %v769_v60 = vpack.c.bf16 %v768_v59, %v768_v59 }
 0x6b9   : > { %1708 = vrcp.f32 %v765_v18 }
 0x6ba   : > { %1545 = vmatmul.mubr.bf16.vlgmr.msra.gmra.mrb[12].mxu1 %v769_v60  ;;  %v823_v60 = vunpack.c.l.bf16 %v2202_v58 }
 0x6bb   : > { %1549 = vmatpush3.bf16.msra.mxu1 %v1939_v20  ;;  %1564 = vmatprep.mubr.msk.bf16.mxu1 %vm1770_vm0, %v1769_v21 }
 0x6bc   : > { %1550 = vmatprep.subr.bf16.mxu1 %v1769_v21 }
 0x6bf   : > { %1551 = vmatpush3.bf16.msra.mxu1 %v1947_v22 }
 0x6c0   : > { %1552 = vmatprep.subr.bf16.mxu1 %v1769_v21 }
 0x6c3   : > { %1553 = vmatpush3.bf16.msra.mxu1 %v1954_v23  ;;  %v1709_v35 = vpop.eup %1708 }
 0x6c4   : > { %1554 = vmatprep.subr.bf16.mxu1 %v1769_v21  ;;  %v813_v36 = vsub.f32 1.0, %v1709_v35  ;;  %v812_v38 = vmul.f32 %v1709_v35, %v2113_v47 }
 0x6c7   : > { %1555 = vmatpush3.bf16.msra.mxu1 %v1961_v24 }
 0x6c8   : > { %1556 = vmatprep.subr.bf16.mxu1 %v1769_v21 }
 0x6cb   : > { %1557 = vmatpush3.bf16.msra.mxu1 %v1968_v25 }
 0x6cc   : > { %1558 = vmatprep.subr.bf16.mxu1 %v1769_v21 }
 0x6cf   : > { %1559 = vmatpush3.bf16.msra.mxu1 %v1975_v26 }
 0x6d0   : > { %1560 = vmatprep.subr.bf16.mxu1 %v1769_v21 }
 0x6d3   : > { %1561 = vmatpush3.bf16.msra.mxu1 %v1982_v27 }
 0x6d4   : > { %1562 = vmatprep.subr.bf16.mxu1 %v1769_v21 }
 0x6d7   : > { %1563 = vmatpush3.bf16.msra.mxu1 %v1989_v28 }
 0x6d8   : > { %1568 = vmatprep.subr.bf16.mxu1 %v1769_v21 }
 0x78d   : > { %v804_v29 = vpop.f32.mrb[12].mxu1 }
 0x78e   : > { %v810_v30 = vadd.f32 %v804_v29, %v711_v19  ;;  %v1546_v31 = vpop.f32.mrb[13].mxu1 }
 0x78f   : > { %v807_v32 = vpop.f32.mrb[14].mxu1 }
 0x790   : > { %1710 = vtanh.f32 %v810_v30  ;;  %v1547_v34 = vpop.f32.mrb[15].mxu1 }
 0x79a   : > { %v1711_v37 = vpop.eup %1710 }
 0x79b   : > { %v814_v39 = vmul.f32 %v1711_v37, %v813_v36 }
 0x79d   : > { %v2158_v40 = vadd.f32 %v814_v39, %v812_v38 }
 0x79f   : > { %1373 = vst [vmem:[%s1807_s22 + $0x18] sm:$0xff] %v2158_v40  ;;  %v824_v33 = vpack.c.bf16 %v2158_v40, %v2158_v40 }
 0x7a1   : > { %858 = vmatmul.mubr.bf16.vlgmr.msra.gmra.mrb[16].mxu0 %v824_v33 }
 0x7a2   : > { %938 = vmatpush1.bf16.msra.mxu0 %v1825_v2  ;;  %969 = vmatprep.mubr.bf16.mxu0 %v1768_v3 }
 0x7a3   : > { %939 = vmatprep.subr.bf16.mxu0 %v1832_v4 }
 0x7a6   : > { %940 = vmatpush1.bf16.msra.mxu0 %v1838_v5 }
 0x7a7   : > { %941 = vmatprep.subr.bf16.mxu0 %v1844_v6 }
 0x7aa   : > { %942 = vmatpush1.bf16.msra.mxu0 %v1850_v7 }
 0x7ab   : > { %943 = vmatprep.subr.bf16.mxu0 %v1856_v8 }
 0x7ae   : > { %944 = vmatpush1.bf16.msra.mxu0 %v1861_v9 }
 0x7af   : > { %945 = vmatprep.subr.bf16.mxu0 %v1867_v10 }
 0x7b2   : > { %946 = vmatpush1.bf16.msra.mxu0 %v1873_v11 }
 0x7b3   : > { %947 = vmatprep.subr.bf16.mxu0 %v1880_v12 }
 0x7b6   : > { %948 = vmatpush1.bf16.msra.mxu0 %v1886_v13 }
 0x7b7   : > { %949 = vmatprep.subr.bf16.mxu0 %v1892_v14 }
 0x7ba   : > { %950 = vmatpush1.bf16.msra.mxu0 %v1898_v15 }
 0x7bb   : > { %951 = vmatprep.subr.bf16.mxu0 %v1904_v16 }
 0x7be   : > { %952 = vmatpush1.bf16.msra.mxu0 %v1910_v17 }
 0x7bf   : > { %1049 = vmatprep.subr.bf16.mxu0 %v1820_v1 }
 0x874   : > { %v859_v43 = vpop.f32.mrb[16].mxu0 }
 0x875   : > { %v866_v44 = vadd.f32 %v859_v43, %v821_v42  ;;  %v861_v45 = vpop.f32.mrb[17].mxu0 }
 0x876   : > { %v863_v47 = vpop.f32.mrb[18].mxu0  ;;  %v873_v55 = vadd.f32 %v861_v45, %v822_v54 }
 0x877   : > { %v1376_v48 = vmul.f32 -1.442695, %v866_v44  ;;  %v864_v49 = vpop.f32.mrb[19].mxu0  ;;  %v935_v44 = vunpack.c.h.bf16 %v2202_v58  ;;  %v1753_v58 = vld [vmem:[%s2318_s2 + $0x14] ss:$8 sps:$4 sm:$0xff]  }
 0x878   : > { %v1377_v56 = vmul.f32 -1.442695, %v873_v55 }
 0x879   : > { %1712 = vpow2.f32 %v1376_v48 }
 0x883   : > { %v1713_v50 = vpop.eup %1712 }
 0x884   : > { %v870_v51 = vadd.f32 1.0, %v1713_v50 }
 0x886   : > { %1714 = vrcp.f32 %v870_v51 }
 0x887   : > { %1716 = vpow2.f32 %v1377_v56 }
 0x890   : > { %v1715_v52 = vpop.eup %1714 }
 0x891   : > { %v880_v53 = vmul.f32 %v1715_v52, %v2158_v40  ;;  %v1717_v57 = vpop.eup %1716 }
 0x892   : > { %v877_v59 = vadd.f32 1.0, %v1717_v57  ;;  %v1752_v57 = vld [vmem:[%s2318_s2] ss:$8 sps:$4 sm:$0xff]  }
 0x893   : > { %v881_v46 = vpack.c.bf16 %v880_v53, %v880_v53 }
 0x894   : > { %1718 = vrcp.f32 %v877_v59  ;;  %v1754_v59 = vld [vmem:[%s2318_s2 + $0x10] ss:$8 sps:$4 sm:$0xff]  }
 0x895   : > { %1565 = vmatmul.mubr.bf16.vlgmr.msra.gmra.mrb[16].mxu1 %v881_v46 }
 0x896   : > { %1569 = vmatpush3.bf16.msra.mxu1 %v1939_v20  ;;  %1584 = vmatprep.mubr.msk.bf16.mxu1 %vm1770_vm0, %v1769_v21 }
 0x897   : > { %1570 = vmatprep.subr.bf16.mxu1 %v1769_v21 }
 0x89a   : > { %1571 = vmatpush3.bf16.msra.mxu1 %v1947_v22 }
 0x89b   : > { %1572 = vmatprep.subr.bf16.mxu1 %v1769_v21 }
 0x89e   : > { %1573 = vmatpush3.bf16.msra.mxu1 %v1954_v23  ;;  %v1719_v19 = vpop.eup %1718 }
 0x89f   : > { %1574 = vmatprep.subr.bf16.mxu1 %v1769_v21  ;;  %v925_v29 = vsub.f32 1.0, %v1719_v19  ;;  %v924_v31 = vmul.f32 %v1719_v19, %v2158_v40 }
 0x8a2   : > { %1575 = vmatpush3.bf16.msra.mxu1 %v1961_v24 }
 0x8a3   : > { %1576 = vmatprep.subr.bf16.mxu1 %v1769_v21 }
 0x8a6   : > { %1577 = vmatpush3.bf16.msra.mxu1 %v1968_v25 }
 0x8a7   : > { %1578 = vmatprep.subr.bf16.mxu1 %v1769_v21 }
 0x8aa   : > { %1579 = vmatpush3.bf16.msra.mxu1 %v1975_v26 }
 0x8ab   : > { %1580 = vmatprep.subr.bf16.mxu1 %v1769_v21 }
 0x8ae   : > { %1581 = vmatpush3.bf16.msra.mxu1 %v1982_v27 }
 0x8af   : > { %1582 = vmatprep.subr.bf16.mxu1 %v1769_v21 }
 0x8b2   : > { %1583 = vmatpush3.bf16.msra.mxu1 %v1989_v28 }
 0x8b3   : > { %1588 = vmatprep.subr.bf16.mxu1 %v1769_v21 }
 0x968   : > { %v916_v61 = vpop.f32.mrb[16].mxu1 }
 0x969   : > { %v922_v62 = vadd.f32 %v916_v61, %v823_v60  ;;  %v1566_v63 = vpop.f32.mrb[17].mxu1  ;;  %v1755_v60 = vld [vmem:[%s2318_s2 + $0x24] ss:$8 sps:$4 sm:$0xff]   ;;  %v1757_v61 = vld [vmem:[%s2318_s2 + $0x34] ss:$8 sps:$4 sm:$0xff]  }
 0x96a   : > { %v919_v0 = vpop.f32.mrb[18].mxu1  ;;  %v1759_v63 = vld [vmem:[%s2318_s2 + $0x44] ss:$8 sps:$4 sm:$0xff]  }
 0x96b   : > { %1720 = vtanh.f32 %v922_v62  ;;  %v1567_v18 = vpop.f32.mrb[19].mxu1  ;;  %v1758_v62 = vld [vmem:[%s2318_s2 + $0x30] ss:$8 sps:$4 sm:$0xff]   ;;  %v1384_v0 = vld [vmem:[%s1812_s25 + $0x48] sm:$0xff] }
 0x96c   : > { %v1045_v18 = vunpack.c.l.bf16 %v1384_v0 }
 0x975   : > { %v1721_v30 = vpop.eup %1720 }
 0x976   : > { %v926_v32 = vmul.f32 %v1721_v30, %v925_v29 }
 0x978   : > { %v2206_v34 = vadd.f32 %v926_v32, %v924_v31 }
 0x97a   : > { %1378 = vst [vmem:[%s1807_s22 + $0x20] sm:$0xff] %v2206_v34  ;;  %v936_v35 = vpack.c.bf16 %v2206_v34, %v2206_v34 }
 0x97c   : > { %970 = vmatmul.mubr.bf16.vlgmr.msra.gmra.mrb[20].mxu0 %v936_v35 }
 0x97d   : > { %1050 = vmatpush1.bf16.msra.mxu0 %v1825_v2  ;;  %1081 = vmatprep.mubr.bf16.mxu0 %v1768_v3  ;;  %v1379_v2 = vld [vmem:[%s1812_s25 + $0x3c] sm:$0xff] }
 0x97e   : > { %1051 = vmatprep.subr.bf16.mxu0 %v1832_v4  ;;  %v933_v4 = vunpack.c.l.bf16 %v1379_v2 }
 0x981   : > { %1052 = vmatpush1.bf16.msra.mxu0 %v1838_v5 }
 0x982   : > { %1053 = vmatprep.subr.bf16.mxu0 %v1844_v6 }
 0x985   : > { %1054 = vmatpush1.bf16.msra.mxu0 %v1850_v7 }
 0x986   : > { %1055 = vmatprep.subr.bf16.mxu0 %v1856_v8 }
 0x989   : > { %1056 = vmatpush1.bf16.msra.mxu0 %v1861_v9 }
 0x98a   : > { %1057 = vmatprep.subr.bf16.mxu0 %v1867_v10 }
 0x98d   : > { %1058 = vmatpush1.bf16.msra.mxu0 %v1873_v11 }
 0x98e   : > { %1059 = vmatprep.subr.bf16.mxu0 %v1880_v12 }
 0x991   : > { %1060 = vmatpush1.bf16.msra.mxu0 %v1886_v13 }
 0x992   : > { %1061 = vmatprep.subr.bf16.mxu0 %v1892_v14 }
 0x995   : > { %1062 = vmatpush1.bf16.msra.mxu0 %v1898_v15 }
 0x996   : > { %1063 = vmatprep.subr.bf16.mxu0 %v1904_v16 }
 0x999   : > { %1064 = vmatpush1.bf16.msra.mxu0 %v1910_v17 }
 0x99a   : > { %1161 = vmatprep.subr.bf16.mxu0 %v1820_v1  ;;  %v934_v1 = vunpack.c.h.bf16 %v1379_v2 }
 0xa4f   : > { %v971_v5 = vpop.f32.mrb[20].mxu0 }
 0xa50   : > { %v978_v6 = vadd.f32 %v971_v5, %v933_v4  ;;  %v973_v7 = vpop.f32.mrb[21].mxu0 }
 0xa51   : > { %v975_v8 = vpop.f32.mrb[22].mxu0  ;;  %v985_v33 = vadd.f32 %v973_v7, %v934_v1 }
 0xa52   : > { %v1381_v9 = vmul.f32 -1.442695, %v978_v6  ;;  %v976_v10 = vpop.f32.mrb[23].mxu0 }
 0xa53   : > { %v1382_v41 = vmul.f32 -1.442695, %v985_v33  ;;  %v1389_v10 = vld [vmem:[%s1812_s25 + $0x54] sm:$0xff] }
 0xa54   : > { %1722 = vpow2.f32 %v1381_v9 }
 0xa5e   : > { %v1723_v36 = vpop.eup %1722 }
 0xa5f   : > { %v982_v37 = vadd.f32 1.0, %v1723_v36  ;;  %v1157_v36 = vunpack.c.l.bf16 %v1389_v10 }
 0xa61   : > { %1724 = vrcp.f32 %v982_v37 }
 0xa62   : > { %1726 = vpow2.f32 %v1382_v41 }
 0xa6b   : > { %v1725_v38 = vpop.eup %1724 }
 0xa6c   : > { %v992_v39 = vmul.f32 %v1725_v38, %v2206_v34  ;;  %v1727_v42 = vpop.eup %1726 }
 0xa6d   : > { %v989_v43 = vadd.f32 1.0, %v1727_v42 }
 0xa6e   : > { %v993_v40 = vpack.c.bf16 %v992_v39, %v992_v39 }
 0xa6f   : > { %1728 = vrcp.f32 %v989_v43 }
 0xa70   : > { %1585 = vmatmul.mubr.bf16.vlgmr.msra.gmra.mrb[20].mxu1 %v993_v40 }
 0xa71   : > { %1589 = vmatpush3.bf16.msra.mxu1 %v1939_v20  ;;  %1604 = vmatprep.mubr.msk.bf16.mxu1 %vm1770_vm0, %v1769_v21 }
 0xa72   : > { %1590 = vmatprep.subr.bf16.mxu1 %v1769_v21 }
 0xa75   : > { %1591 = vmatpush3.bf16.msra.mxu1 %v1947_v22 }
 0xa76   : > { %1592 = vmatprep.subr.bf16.mxu1 %v1769_v21 }
 0xa79   : > { %1593 = vmatpush3.bf16.msra.mxu1 %v1954_v23  ;;  %v1729_v51 = vpop.eup %1728 }
 0xa7a   : > { %1594 = vmatprep.subr.bf16.mxu1 %v1769_v21  ;;  %v1037_v52 = vsub.f32 1.0, %v1729_v51  ;;  %v1036_v46 = vmul.f32 %v1729_v51, %v2206_v34 }
 0xa7d   : > { %1595 = vmatpush3.bf16.msra.mxu1 %v1961_v24 }
 0xa7e   : > { %1596 = vmatprep.subr.bf16.mxu1 %v1769_v21 }
 0xa81   : > { %1597 = vmatpush3.bf16.msra.mxu1 %v1968_v25 }
 0xa82   : > { %1598 = vmatprep.subr.bf16.mxu1 %v1769_v21 }
 0xa85   : > { %1599 = vmatpush3.bf16.msra.mxu1 %v1975_v26 }
 0xa86   : > { %1600 = vmatprep.subr.bf16.mxu1 %v1769_v21 }
 0xa89   : > { %1601 = vmatpush3.bf16.msra.mxu1 %v1982_v27 }
 0xa8a   : > { %1602 = vmatprep.subr.bf16.mxu1 %v1769_v21 }
 0xa8d   : > { %1603 = vmatpush3.bf16.msra.mxu1 %v1989_v28 }
 0xa8e   : > { %1608 = vmatprep.subr.bf16.mxu1 %v1769_v21 }
 0xb43   : > { %v1028_v45 = vpop.f32.mrb[20].mxu1 }
 0xb44   : > { %v1034_v47 = vadd.f32 %v1028_v45, %v935_v44  ;;  %v1586_v48 = vpop.f32.mrb[21].mxu1 }
 0xb45   : > { %v1031_v49 = vpop.f32.mrb[22].mxu1 }
 0xb46   : > { %1730 = vtanh.f32 %v1034_v47  ;;  %v1587_v50 = vpop.f32.mrb[23].mxu1  ;;  %v1158_v47 = vunpack.c.h.bf16 %v1389_v10 }
 0xb50   : > { %v1731_v53 = vpop.eup %1730 }
 0xb51   : > { %v1038_v54 = vmul.f32 %v1731_v53, %v1037_v52 }
 0xb53   : > { %v2251_v55 = vadd.f32 %v1038_v54, %v1036_v46 }
 0xb55   : > { %1383 = vst [vmem:[%s1807_s22 + $0x28] sm:$0xff] %v2251_v55  ;;  %v1048_v56 = vpack.c.bf16 %v2251_v55, %v2251_v55 }
 0xb57   : > { %1082 = vmatmul.mubr.bf16.vlgmr.msra.gmra.mrb[24].mxu0 %v1048_v56 }
 0xb58   : > { %1162 = vmatpush1.bf16.msra.mxu0 %v1752_v57  ;;  %1193 = vmatprep.mubr.bf16.mxu0 %v1768_v3  ;;  %v1756_v3 = vld [vmem:[%s2318_s2 + $0x20] ss:$8 sps:$4 sm:$0xff]  }
 0xb59   : > { %1163 = vmatprep.subr.bf16.mxu0 %v1753_v58 }
 0xb5c   : > { %1164 = vmatpush1.bf16.msra.mxu0 %v1754_v59 }
 0xb5d   : > { %1165 = vmatprep.subr.bf16.mxu0 %v1755_v60 }
 0xb60   : > { %1166 = vmatpush1.bf16.msra.mxu0 %v1756_v3 }
 0xb61   : > { %1167 = vmatprep.subr.bf16.mxu0 %v1757_v61 }
 0xb64   : > { %1168 = vmatpush1.bf16.msra.mxu0 %v1758_v62 }
 0xb65   : > { %1169 = vmatprep.subr.bf16.mxu0 %v1759_v63 }
 0xb68   : > { %1170 = vmatpush1.bf16.msra.mxu0 %v1873_v11 }
 0xb69   : > { %1171 = vmatprep.subr.bf16.mxu0 %v1880_v12 }
 0xb6c   : > { %1172 = vmatpush1.bf16.msra.mxu0 %v1886_v13 }
 0xb6d   : > { %1173 = vmatprep.subr.bf16.mxu0 %v1892_v14 }
 0xb70   : > { %1174 = vmatpush1.bf16.msra.mxu0 %v1898_v15 }
 0xb71   : > { %1175 = vmatprep.subr.bf16.mxu0 %v1904_v16  ;;  %v1046_v16 = vunpack.c.h.bf16 %v1384_v0 }
 0xb74   : > { %1176 = vmatpush1.bf16.msra.mxu0 %v1910_v17 }
 0xc2a   : > { %v1083_v19 = vpop.f32.mrb[24].mxu0 }
 0xc2b   : > { %v1090_v29 = vadd.f32 %v1083_v19, %v1045_v18  ;;  %v1085_v30 = vpop.f32.mrb[25].mxu0 }
 0xc2c   : > { %v1087_v31 = vpop.f32.mrb[26].mxu0  ;;  %v1097_v17 = vadd.f32 %v1085_v30, %v1046_v16 }
 0xc2d   : > { %v1386_v32 = vmul.f32 -1.442695, %v1090_v29  ;;  %v1088_v11 = vpop.f32.mrb[27].mxu0 }
 0xc2f   : > { %1732 = vpow2.f32 %v1386_v32 }
 0xc39   : > { %v1733_v12 = vpop.eup %1732 }
 0xc3a   : > { %v1094_v34 = vadd.f32 1.0, %v1733_v12 }
 0xc3c   : > { %1734 = vrcp.f32 %v1094_v34 }
 0xc46   : > { %v1735_v13 = vpop.eup %1734 }
 0xc47   : > { %v1104_v14 = vmul.f32 %v1735_v13, %v2251_v55 }
 0xc49   : > { %v1105_v15 = vpack.c.bf16 %v1104_v14, %v1104_v14 }
 0xc4b   : > { %1605 = vmatmul.mubr.bf16.vlgmr.msra.gmra.mrb[24].mxu1 %v1105_v15 }
 0xc4c   : > { %1609 = vmatpush3.bf16.msra.mxu1 %v1939_v20  ;;  %1624 = vmatprep.mubr.msk.bf16.mxu1 %vm1770_vm0, %v1769_v21  ;;  %v1387_v20 = vmul.f32 -1.442695, %v1097_v17 }
 0xc4d   : > { %1610 = vmatprep.subr.bf16.mxu1 %v1769_v21 }
 0xc4e   : > { %1736 = vpow2.f32 %v1387_v20 }
 0xc50   : > { %1611 = vmatpush3.bf16.msra.mxu1 %v1947_v22 }
 0xc51   : > { %1612 = vmatprep.subr.bf16.mxu1 %v1769_v21 }
 0xc54   : > { %1613 = vmatpush3.bf16.msra.mxu1 %v1954_v23  ;;  %v1385_v23 = vld [vmem:[%s1812_s25 + $0x50] ss:$12 sps:$4 sm:$0xff]  }
 0xc55   : > { %1614 = vmatprep.subr.bf16.mxu1 %v1769_v21  ;;  %v1159_v52 = vunpack.c.h.bf16 %v1385_v23 }
 0xc58   : > { %1615 = vmatpush3.bf16.msra.mxu1 %v1961_v24  ;;  %v1737_v22 = vpop.eup %1736 }
 0xc59   : > { %1616 = vmatprep.subr.bf16.mxu1 %v1769_v21  ;;  %v1101_v24 = vadd.f32 1.0, %v1737_v22 }
 0xc5b   : > { %1738 = vrcp.f32 %v1101_v24 }
 0xc5c   : > { %1617 = vmatpush3.bf16.msra.mxu1 %v1968_v25  ;;  %v1047_v25 = vunpack.c.l.bf16 %v1385_v23 }
 0xc5d   : > { %1618 = vmatprep.subr.bf16.mxu1 %v1769_v21 }
 0xc60   : > { %1619 = vmatpush3.bf16.msra.mxu1 %v1975_v26 }
 0xc61   : > { %1620 = vmatprep.subr.bf16.mxu1 %v1769_v21 }
 0xc64   : > { %1621 = vmatpush3.bf16.msra.mxu1 %v1982_v27 }
 0xc65   : > { %1622 = vmatprep.subr.bf16.mxu1 %v1769_v21  ;;  %v1739_v21 = vpop.eup %1738 }
 0xc66   : > { %v1149_v5 = vsub.f32 1.0, %v1739_v21  ;;  %v1148_v6 = vmul.f32 %v1739_v21, %v2251_v55 }
 0xc68   : > { %1623 = vmatpush3.bf16.msra.mxu1 %v1989_v28 }
 0xd1e   : > { %v1140_v26 = vpop.f32.mrb[24].mxu1 }
 0xd1f   : > { %v1146_v35 = vadd.f32 %v1140_v26, %v1047_v25  ;;  %v1606_v2 = vpop.f32.mrb[25].mxu1 }
 0xd20   : > { %v1143_v4 = vpop.f32.mrb[26].mxu1 }
 0xd21   : > { %1740 = vtanh.f32 %v1146_v35  ;;  %v1607_v27 = vpop.f32.mrb[27].mxu1 }
 0xd2b   : > { %v1741_v28 = vpop.eup %1740 }
 0xd2c   : > { %v1150_v7 = vmul.f32 %v1741_v28, %v1149_v5 }
 0xd2e   : > { %v1151_v8 = vadd.f32 %v1150_v7, %v1148_v6 }
 0xd30   : > { %1388 = vst [vmem:[%s1807_s22 + $0x30] sm:$0xff] %v1151_v8  ;;  %v1160_v9 = vpack.c.bf16 %v1151_v8, %v1151_v8 }
 0xd32   : > { %1194 = vmatmul.mubr.bf16.vlgmr.msra.gmra.mrb[28].mxu0 %v1160_v9 }
 0xe05   : > { %v1195_v37 = vpop.f32.mrb[28].mxu0 }
 0xe06   : > { %v1202_v38 = vadd.f32 %v1195_v37, %v1157_v36  ;;  %v1197_v39 = vpop.f32.mrb[29].mxu0 }
 0xe07   : > { %v1199_v40 = vpop.f32.mrb[30].mxu0  ;;  %v1209_v48 = vadd.f32 %v1197_v39, %v1158_v47 }
 0xe08   : > { %v1391_v1 = vmul.f32 -1.442695, %v1202_v38  ;;  %v1200_v33 = vpop.f32.mrb[31].mxu0 }
 0xe09   : > { %v1392_v49 = vmul.f32 -1.442695, %v1209_v48 }
 0xe0a   : > { %1742 = vpow2.f32 %v1391_v1 }
 0xe14   : > { %v1743_v41 = vpop.eup %1742 }
 0xe15   : > { %v1206_v42 = vadd.f32 1.0, %v1743_v41 }
 0xe17   : > { %1744 = vrcp.f32 %v1206_v42 }
 0xe18   : > { %1746 = vpow2.f32 %v1392_v49 }
 0xe21   : > { %v1745_v43 = vpop.eup %1744 }
 0xe22   : > { %v1216_v44 = vmul.f32 %v1745_v43, %v1151_v8  ;;  %v1747_v50 = vpop.eup %1746 }
 0xe23   : > { %v1213_v51 = vadd.f32 1.0, %v1747_v50 }
 0xe24   : > { %v1217_v45 = vpack.c.bf16 %v1216_v44, %v1216_v44 }
 0xe25   : > { %1748 = vrcp.f32 %v1213_v51 }
 0xe26   : > { %1625 = vmatmul.mubr.bf16.vlgmr.msra.gmra.mrb[28].mxu1 %v1217_v45 }
 0xe2f   : > { %v1749_v57 = vpop.eup %1748 }
 0xe30   : > { %v1261_v58 = vsub.f32 1.0, %v1749_v57  ;;  %v1260_v60 = vmul.f32 %v1749_v57, %v1151_v8 }
 0xef9   : > { %v1252_v53 = vpop.f32.mrb[28].mxu1 }
 0xefa   : > { %v1258_v46 = vadd.f32 %v1252_v53, %v1159_v52  ;;  %v1626_v54 = vpop.f32.mrb[29].mxu1 }
 0xefb   : > { %v1255_v55 = vpop.f32.mrb[30].mxu1 }
 0xefc   : > { %1750 = vtanh.f32 %v1258_v46  ;;  %v1627_v56 = vpop.f32.mrb[31].mxu1 }
 0xf06   : > { %v1751_v59 = vpop.eup %1750 }
 0xf07   : > { %v1262_v3 = vmul.f32 %v1751_v59, %v1261_v58 }
 0xf09   : > { %v1263_v61 = vadd.f32 %v1262_v3, %v1260_v60 }
 0xf0b   : > { %1393 = vst [vmem:[%s1807_s22 + $0x38] sm:$0xff] %v1263_v61  ;;  %1266 = vst [vmem:[#allocation2] sm:$0xff] %v1263_v61 }
 0xf0c PF: > { %s14_s15 = sadd.s32 1, %s1766_s15  }
 0xf0d   : > { %p11_p5 = scmp.ge.s32.totalorder %s14_s15, 4  }
 0xf0f   :  { %13 = sbr.rel (!%p11_p5) target bundleno = 1 (0x1), region = 84 }

</bundles_post_ra>
